<compile_context>
chip_gen: v5e
topology: v5e:2x2
jax: 0.10.0
libtpu: 0.0.40
codegen_flags: <defaults>
</compile_context>

<pallas_src>
import functools
import math

import jax
import jax.numpy as jnp
from jax.experimental import pallas as pl
from jax.experimental.pallas import tpu as pltpu


# ----------------------------- in-kernel helpers -----------------------------

def _layernorm(x, gamma, beta, eps=1e-5):
    mean = jnp.mean(x, axis=-1, keepdims=True)
    var = jnp.mean((x - mean) ** 2, axis=-1, keepdims=True)
    return (x - mean) * jax.lax.rsqrt(var + eps) * gamma + beta


def _gelu_exact(x):
    # F.gelu default (erf-based, exact)
    return 0.5 * x * (1.0 + jax.lax.erf(x * (1.0 / math.sqrt(2.0))))


def _softmax_lastdim(x):
    m = jnp.max(x, axis=-1, keepdims=True)
    e = jnp.exp(x - m)
    return e * pl.reciprocal(jnp.sum(e, axis=-1, keepdims=True), approx=True)


# --------------------------------- kernel ------------------------------------

def transformer_kernel(num_heads,
                       x_ref, pe_ref,
                       wqkv_ref, bqkv_ref,
                       wo_ref, bo_ref,
                       g1_ref, be1_ref,
                       w1_ref, b1_ref, w2_ref, b2_ref,
                       g2_ref, be2_ref,
                       wc_ref, bc_ref,
                       out_ref):
    BB, S, E = x_ref.shape
    Dh = E // num_heads

    # --- positional encoding (pe broadcast over the batch block) ---
    x = x_ref[...].astype(jnp.float32) + pe_ref[...]           # (BB, S, E)
    x2 = x.reshape(BB * S, E)                                   # flattened for matmuls

    # --- fused QKV projection (scale folded into Q columns at setup time) ---
    qkv = jnp.dot(x2, wqkv_ref[...], preferred_element_type=jnp.float32) + bqkv_ref[...]
    q3 = qkv[:, 0 * E:1 * E].reshape(BB, S, E)
    k3 = qkv[:, 1 * E:2 * E].reshape(BB, S, E)
    v3 = qkv[:, 2 * E:3 * E].reshape(BB, S, E)

    # --- multi-head self-attention; accumulate each head through wo (no concat) ---
    attn = jnp.zeros((BB * S, E), jnp.float32)
    for h in range(num_heads):
        lo, hi = h * Dh, (h + 1) * Dh
        qh = q3[:, :, lo:hi]                                    # (BB, S, Dh)
        kh = k3[:, :, lo:hi]
        vh = v3[:, :, lo:hi]
        scores = jnp.einsum('bqd,bkd->bqk', qh, kh,
                            preferred_element_type=jnp.float32)  # (BB, S, S)
        probs = _softmax_lastdim(scores)
        ctx = jnp.einsum('bqk,bkd->bqd', probs, vh,
                         preferred_element_type=jnp.float32)     # (BB, S, Dh)
        attn = attn + jnp.dot(ctx.reshape(BB * S, Dh), wo_ref[lo:hi, :],
                              preferred_element_type=jnp.float32)
    attn = attn + bo_ref[...]

    # --- residual + LayerNorm 1 ---
    x2 = _layernorm(x2 + attn, g1_ref[...], be1_ref[...])

    # --- feed-forward: linear2(gelu(linear1(x))) ---
    hdn = _gelu_exact(jnp.dot(x2, w1_ref[...], preferred_element_type=jnp.float32) + b1_ref[...])
    ff = jnp.dot(hdn, w2_ref[...], preferred_element_type=jnp.float32) + b2_ref[...]

    # --- residual + LayerNorm 2 ---
    x2 = _layernorm(x2 + ff, g2_ref[...], be2_ref[...])

    # --- transpose(1,2) + AdaptiveAvgPool1d(1) == mean over sequence ---
    pooled = jnp.mean(x2.reshape(BB, S, E), axis=1)             # (BB, E)

    # --- classifier head (wc padded to 128 lanes -> lane-dense store) ---
    logits = jnp.dot(pooled, wc_ref[...], preferred_element_type=jnp.float32) + bc_ref[...]
    out_ref[...] = logits.astype(out_ref.dtype)                 # (BB, C_pad)


# -------------------------------- wrapper -------------------------------------

def transformer_classifier(x, params, num_heads, block_b=None):
    B, S, E = x.shape
    C = params["wc"].shape[1]
    C_pad = max(128, ((C + 127) // 128) * 128)                  # lane-dense output

    # batch block: aim for >= 128 matmul rows per grid step, never exceed B
    if block_b is None:
        block_b = min(B, max(1, 128 // max(S, 1)))
    BB = block_b
    B_pad = ((B + BB - 1) // BB) * BB
    if B_pad != B:
        x = jnp.concatenate([x, jnp.zeros((B_pad - B, S, E), x.dtype)], axis=0)

    pe = params["pe"][:S]                                       # (S, E)
    scale = 1.0 / math.sqrt(E // num_heads)
    # fused QKV with the attention scale folded into the Q columns
    wqkv = jnp.concatenate([params["wq"] * scale, params["wk"], params["wv"]], axis=1)
    bqkv = jnp.concatenate([params["bq"] * scale, params["bk"], params["bv"]], axis=1)
    wc_pad = jnp.zeros((E, C_pad), jnp.float32).at[:, :C].set(params["wc"])
    bc_pad = jnp.zeros((1, C_pad), jnp.float32).at[:, :C].set(params["bc"])

    weights = [wqkv, bqkv, params["wo"], params["bo"],
               params["g1"], params["be1"],
               params["w1"], params["b1"], params["w2"], params["b2"],
               params["g2"], params["be2"],
               wc_pad, bc_pad]

    def full_spec(arr):
        nd = arr.ndim
        return pl.BlockSpec(arr.shape, lambda b, _nd=nd: (0,) * _nd)

    in_specs = ([pl.BlockSpec((BB, S, E), lambda b: (b, 0, 0)),  # one batch block per step
                 full_spec(pe)]
                + [full_spec(w) for w in weights])

    out_spec = pl.BlockSpec((BB, C_pad), lambda b: (b, 0))

    kernel = functools.partial(transformer_kernel, num_heads)

    out = pl.pallas_call(
        kernel,
        out_shape=jax.ShapeDtypeStruct((B_pad, C_pad), jnp.float32),
        grid=(B_pad // BB,),
        in_specs=in_specs,
        out_specs=out_spec,
        compiler_params=pltpu.CompilerParams(
            dimension_semantics=("parallel",),          # lets v7x split batch blocks over 2 TCs
            vmem_limit_bytes=32 * 1024 * 1024),         # headroom; safe on v5e/v6e/v7x
    )(x, pe, *weights)
    return out[:B, :C]


# ----------------------------- parameter setup --------------------------------

def positional_encoding_table(max_len, d_model):
    position = jnp.arange(max_len, dtype=jnp.float32)[:, None]
    div_term = jnp.exp(jnp.arange(0, d_model, 2, dtype=jnp.float32)
                       * (-math.log(10000.0) / d_model))
    pe_sin = jnp.sin(position * div_term)
    pe_cos = jnp.cos(position * div_term)
    pe = jnp.zeros((max_len, d_model), jnp.float32)
    pe = pe.at[:, 0::2].set(pe_sin)
    pe = pe.at[:, 1::2].set(pe_cos)
    return pe


def make_params(key, embed_dim, num_heads, hidden_dim, num_classes, max_len):
    E, H, C = embed_dim, hidden_dim, num_classes
    ks = jax.random.split(key, 20)

    def init(k, shape, scale=0.05):
        return (scale * jax.random.normal(k, shape)).astype(jnp.float32)

    params = {
        "pe": positional_encoding_table(max_len, E),
        # attention in-projections (PyTorch packs them as in_proj_weight[3E,E]; split & transposed)
        "wq": init(ks[0], (E, E)), "bq": init(ks[1], (1, E)),
        "wk": init(ks[2], (E, E)), "bk": init(ks[3], (1, E)),
        "wv": init(ks[4], (E, E)), "bv": init(ks[5], (1, E)),
        "wo": init(ks[6], (E, E)), "bo": init(ks[7], (1, E)),
        # LayerNorm 1
        "g1": jnp.ones((1, E), jnp.float32), "be1": jnp.zeros((1, E), jnp.float32),
        # FFN
        "w1": init(ks[8], (E, H)), "b1": init(ks[9], (1, H)),
        "w2": init(ks[10], (H, E)), "b2": init(ks[11], (1, E)),
        # LayerNorm 2
        "g2": jnp.ones((1, E), jnp.float32), "be2": jnp.zeros((1, E), jnp.float32),
        # classifier
        "wc": init(ks[12], (E, C)), "bc": init(ks[13], (1, C)),
    }
    return params


# ---------------------------- pure-JAX reference -------------------------------

def reference_forward(x, params, num_heads):
    B, S, E = x.shape
    Dh = E // num_heads
    x = x + params["pe"][:S][None]

    q = x @ params["wq"] + params["bq"]
    k = x @ params["wk"] + params["bk"]
    v = x @ params["wv"] + params["bv"]

    def split(t):  # (B,S,E) -> (B,heads,S,Dh)
        return t.reshape(B, S, num_heads, Dh).transpose(0, 2, 1, 3)

    qh, kh, vh = split(q), split(k), split(v)
    scores = jnp.einsum("bhsd,bhtd->bhst", qh, kh) / math.sqrt(Dh)
    probs = jax.nn.softmax(scores, axis=-1)
    ctx = jnp.einsum("bhst,bhtd->bhsd", probs, vh)
    ctx = ctx.transpose(0, 2, 1, 3).reshape(B, S, E)
    attn_out = ctx @ params["wo"] + params["bo"]

    def ln(t, g, b, eps=1e-5):
        m = jnp.mean(t, -1, keepdims=True)
        var = jnp.mean((t - m) ** 2, -1, keepdims=True)
        return (t - m) / jnp.sqrt(var + eps) * g + b

    x = ln(x + attn_out, params["g1"], params["be1"])
    ff = jax.nn.gelu(x @ params["w1"] + params["b1"], approximate=False) @ params["w2"] + params["b2"]
    x = ln(x + ff, params["g2"], params["be2"])
    pooled = jnp.mean(x, axis=1)                       # AdaptiveAvgPool1d(1) over seq
    return pooled @ params["wc"] + params["bc"]


# ----------------------------------- main --------------------------------------

if __name__ == "__main__":
    # small shapes consistent with the module's forward (batch, seq, embed_dim)
    B, S = 2, 8
    EMBED_DIM, NUM_HEADS, HIDDEN_DIM, NUM_CLASSES, MAX_LEN = 32, 4, 64, 10, 16

    key = jax.random.PRNGKey(0)
    k_x, k_p = jax.random.split(key)
    x = jax.random.normal(k_x, (B, S, EMBED_DIM), dtype=jnp.float32)
    params = make_params(k_p, EMBED_DIM, NUM_HEADS, HIDDEN_DIM, NUM_CLASSES, MAX_LEN)

    out = transformer_classifier(x, params, NUM_HEADS)
    out = jax.block_until_ready(out)

    ref = jax.block_until_ready(reference_forward(x, params, NUM_HEADS))
    assert out.shape == (B, NUM_CLASSES)
    assert jnp.allclose(out, ref, atol=2e-3, rtol=2e-3), (out, ref)

    print("KERNEL_OK")
</pallas_src>

<mosaic_0001>
module attributes {stable_mosaic.version = 11 : i64} {
  func.func @transformer_kernel(%arg0: i32, %arg1: memref<2x8x32xf32, #tpu.memory_space<vmem>>, %arg2: memref<8x32xf32, #tpu.memory_space<vmem>>, %arg3: memref<32x96xf32, #tpu.memory_space<vmem>>, %arg4: memref<1x96xf32, #tpu.memory_space<vmem>>, %arg5: memref<32x32xf32, #tpu.memory_space<vmem>>, %arg6: memref<1x32xf32, #tpu.memory_space<vmem>>, %arg7: memref<1x32xf32, #tpu.memory_space<vmem>>, %arg8: memref<1x32xf32, #tpu.memory_space<vmem>>, %arg9: memref<32x64xf32, #tpu.memory_space<vmem>>, %arg10: memref<1x64xf32, #tpu.memory_space<vmem>>, %arg11: memref<64x32xf32, #tpu.memory_space<vmem>>, %arg12: memref<1x32xf32, #tpu.memory_space<vmem>>, %arg13: memref<1x32xf32, #tpu.memory_space<vmem>>, %arg14: memref<1x32xf32, #tpu.memory_space<vmem>>, %arg15: memref<32x128xf32, #tpu.memory_space<vmem>>, %arg16: memref<1x128xf32, #tpu.memory_space<vmem>>, %arg17: memref<2x128xf32, #tpu.memory_space<vmem>>) attributes {dimension_semantics = [#tpu.dimension_semantics<parallel>], iteration_bounds = array<i64: 1>, scalar_prefetch = 0 : i64, scratch_operands = 0 : i64, tpu.core_type = #tpu.core_type<tc>, window_params = [{transform_indices = @transform_0, window_bounds = array<i64: 2, 8, 32>}, {pipeline_mode = #tpu.pipeline_mode<synchronous>, transform_indices = @transform_1, window_bounds = array<i64: 8, 32>}, {pipeline_mode = #tpu.pipeline_mode<synchronous>, transform_indices = @transform_2, window_bounds = array<i64: 32, 96>}, {pipeline_mode = #tpu.pipeline_mode<synchronous>, transform_indices = @transform_3, window_bounds = array<i64: 1, 96>}, {pipeline_mode = #tpu.pipeline_mode<synchronous>, transform_indices = @transform_4, window_bounds = array<i64: 32, 32>}, {pipeline_mode = #tpu.pipeline_mode<synchronous>, transform_indices = @transform_5, window_bounds = array<i64: 1, 32>}, {pipeline_mode = #tpu.pipeline_mode<synchronous>, transform_indices = @transform_6, window_bounds = array<i64: 1, 32>}, {pipeline_mode = #tpu.pipeline_mode<synchronous>, transform_indices = @transform_7, window_bounds = array<i64: 1, 32>}, {pipeline_mode = #tpu.pipeline_mode<synchronous>, transform_indices = @transform_8, window_bounds = array<i64: 32, 64>}, {pipeline_mode = #tpu.pipeline_mode<synchronous>, transform_indices = @transform_9, window_bounds = array<i64: 1, 64>}, {pipeline_mode = #tpu.pipeline_mode<synchronous>, transform_indices = @transform_10, window_bounds = array<i64: 64, 32>}, {pipeline_mode = #tpu.pipeline_mode<synchronous>, transform_indices = @transform_11, window_bounds = array<i64: 1, 32>}, {pipeline_mode = #tpu.pipeline_mode<synchronous>, transform_indices = @transform_12, window_bounds = array<i64: 1, 32>}, {pipeline_mode = #tpu.pipeline_mode<synchronous>, transform_indices = @transform_13, window_bounds = array<i64: 1, 32>}, {pipeline_mode = #tpu.pipeline_mode<synchronous>, transform_indices = @transform_14, window_bounds = array<i64: 32, 128>}, {pipeline_mode = #tpu.pipeline_mode<synchronous>, transform_indices = @transform_15, window_bounds = array<i64: 1, 128>}, {transform_indices = @transform_16, window_bounds = array<i64: 2, 128>}]} {
    %c0 = arith.constant 0 : index
    %c0_0 = arith.constant 0 : index
    %c0_1 = arith.constant 0 : index
    %0 = vector.load %arg1[%c0, %c0_0, %c0_1] : memref<2x8x32xf32, #tpu.memory_space<vmem>>, vector<2x8x32xf32>
    %c0_2 = arith.constant 0 : index
    %c0_3 = arith.constant 0 : index
    %1 = vector.load %arg2[%c0_2, %c0_3] : memref<8x32xf32, #tpu.memory_space<vmem>>, vector<8x32xf32>
    %2 = vector.shape_cast %1 : vector<8x32xf32> to vector<1x8x32xf32>
    %3 = vector.broadcast %2 : vector<1x8x32xf32> to vector<2x8x32xf32>
    %4 = arith.addf %0, %3 : vector<2x8x32xf32>
    %5 = vector.shape_cast %4 : vector<2x8x32xf32> to vector<16x32xf32>
    %c0_4 = arith.constant 0 : index
    %c0_5 = arith.constant 0 : index
    %6 = vector.load %arg3[%c0_4, %c0_5] : memref<32x96xf32, #tpu.memory_space<vmem>>, vector<32x96xf32>
    %cst = arith.constant dense<0.000000e+00> : vector<16x96xf32>
    %7 = tpu.matmul %5, %6, %cst {dimension_numbers = #tpu.dot_dimension_numbers<[1], [0], [0], [1], [0, 0, 1, 1], [], []>} : vector<16x32xf32>, vector<32x96xf32>, vector<16x96xf32> -> vector<16x96xf32>
    %c0_6 = arith.constant 0 : index
    %c0_7 = arith.constant 0 : index
    %8 = vector.load %arg4[%c0_6, %c0_7] : memref<1x96xf32, #tpu.memory_space<vmem>>, vector<1x96xf32>
    %9 = vector.broadcast %8 : vector<1x96xf32> to vector<16x96xf32>
    %10 = arith.addf %7, %9 : vector<16x96xf32>
    %11 = vector.extract_strided_slice %10 {offsets = [0, 0], sizes = [16, 32], strides = [1, 1]} : vector<16x96xf32> to vector<16x32xf32>
    %12 = vector.shape_cast %11 : vector<16x32xf32> to vector<2x8x32xf32>
    %13 = vector.extract_strided_slice %10 {offsets = [0, 32], sizes = [16, 32], strides = [1, 1]} : vector<16x96xf32> to vector<16x32xf32>
    %14 = vector.shape_cast %13 : vector<16x32xf32> to vector<2x8x32xf32>
    %15 = vector.extract_strided_slice %10 {offsets = [0, 64], sizes = [16, 32], strides = [1, 1]} : vector<16x96xf32> to vector<16x32xf32>
    %16 = vector.shape_cast %15 : vector<16x32xf32> to vector<2x8x32xf32>
    %cst_8 = arith.constant 0.000000e+00 : f32
    %17 = vector.broadcast %cst_8 : f32 to vector<16x32xf32>
    %18 = vector.extract_strided_slice %12 {offsets = [0, 0, 0], sizes = [2, 8, 8], strides = [1, 1, 1]} : vector<2x8x32xf32> to vector<2x8x8xf32>
    %19 = vector.extract_strided_slice %14 {offsets = [0, 0, 0], sizes = [2, 8, 8], strides = [1, 1, 1]} : vector<2x8x32xf32> to vector<2x8x8xf32>
    %20 = vector.extract_strided_slice %16 {offsets = [0, 0, 0], sizes = [2, 8, 8], strides = [1, 1, 1]} : vector<2x8x32xf32> to vector<2x8x8xf32>
    "tpu.trace_start"() <{level = 10 : i32, message = "bqd,bkd->bqk"}> : () -> ()
    %cst_9 = arith.constant dense<0.000000e+00> : vector<2x8x8xf32>
    %21 = tpu.matmul %18, %19, %cst_9 {dimension_numbers = #tpu.dot_dimension_numbers<[2], [2], [1], [1], [0, 0, 0, 1, 1, 1], [0], [0]>} : vector<2x8x8xf32>, vector<2x8x8xf32>, vector<2x8x8xf32> -> vector<2x8x8xf32>
    "tpu.trace_stop"() : () -> ()
    %cst_10 = arith.constant dense<0xFF800000> : vector<2x8xf32>
    %22 = vector.multi_reduction <maximumf>, %21, %cst_10 [2] : vector<2x8x8xf32> to vector<2x8xf32>
    %23 = vector.shape_cast %22 : vector<2x8xf32> to vector<2x8x1xf32>
    %24 = vector.broadcast %23 : vector<2x8x1xf32> to vector<2x8x8xf32>
    %25 = arith.subf %21, %24 : vector<2x8x8xf32>
    %26 = math.exp %25 : vector<2x8x8xf32>
    %cst_11 = arith.constant dense<0.000000e+00> : vector<2x8xf32>
    %27 = vector.multi_reduction <add>, %26, %cst_11 [2] : vector<2x8x8xf32> to vector<2x8xf32>
    %28 = vector.shape_cast %27 : vector<2x8xf32> to vector<2x8x1xf32>
    %29 = tpu.reciprocal %28 {approx = true} : vector<2x8x1xf32> -> vector<2x8x1xf32>
    %30 = vector.broadcast %29 : vector<2x8x1xf32> to vector<2x8x8xf32>
    %31 = arith.mulf %26, %30 : vector<2x8x8xf32>
    "tpu.trace_start"() <{level = 10 : i32, message = "bqk,bkd->bqd"}> : () -> ()
    %cst_12 = arith.constant dense<0.000000e+00> : vector<2x8x8xf32>
    %32 = tpu.matmul %31, %20, %cst_12 {dimension_numbers = #tpu.dot_dimension_numbers<[2], [1], [1], [2], [0, 0, 0, 1, 1, 2], [0], [0]>} : vector<2x8x8xf32>, vector<2x8x8xf32>, vector<2x8x8xf32> -> vector<2x8x8xf32>
    "tpu.trace_stop"() : () -> ()
    %33 = vector.shape_cast %32 : vector<2x8x8xf32> to vector<16x8xf32>
    %c0_13 = arith.constant 0 : index
    %c0_14 = arith.constant 0 : index
    %34 = vector.load %arg5[%c0_13, %c0_14] : memref<32x32xf32, #tpu.memory_space<vmem>>, vector<8x32xf32>
    %cst_15 = arith.constant dense<0.000000e+00> : vector<16x32xf32>
    %35 = tpu.matmul %33, %34, %cst_15 {dimension_numbers = #tpu.dot_dimension_numbers<[1], [0], [0], [1], [0, 0, 1, 1], [], []>} : vector<16x8xf32>, vector<8x32xf32>, vector<16x32xf32> -> vector<16x32xf32>
    %36 = arith.addf %17, %35 : vector<16x32xf32>
    %37 = vector.extract_strided_slice %12 {offsets = [0, 0, 8], sizes = [2, 8, 8], strides = [1, 1, 1]} : vector<2x8x32xf32> to vector<2x8x8xf32>
    %38 = vector.extract_strided_slice %14 {offsets = [0, 0, 8], sizes = [2, 8, 8], strides = [1, 1, 1]} : vector<2x8x32xf32> to vector<2x8x8xf32>
    %39 = vector.extract_strided_slice %16 {offsets = [0, 0, 8], sizes = [2, 8, 8], strides = [1, 1, 1]} : vector<2x8x32xf32> to vector<2x8x8xf32>
    "tpu.trace_start"() <{level = 10 : i32, message = "bqd,bkd->bqk"}> : () -> ()
    %cst_16 = arith.constant dense<0.000000e+00> : vector<2x8x8xf32>
    %40 = tpu.matmul %37, %38, %cst_16 {dimension_numbers = #tpu.dot_dimension_numbers<[2], [2], [1], [1], [0, 0, 0, 1, 1, 1], [0], [0]>} : vector<2x8x8xf32>, vector<2x8x8xf32>, vector<2x8x8xf32> -> vector<2x8x8xf32>
    "tpu.trace_stop"() : () -> ()
    %cst_17 = arith.constant dense<0xFF800000> : vector<2x8xf32>
    %41 = vector.multi_reduction <maximumf>, %40, %cst_17 [2] : vector<2x8x8xf32> to vector<2x8xf32>
    %42 = vector.shape_cast %41 : vector<2x8xf32> to vector<2x8x1xf32>
    %43 = vector.broadcast %42 : vector<2x8x1xf32> to vector<2x8x8xf32>
    %44 = arith.subf %40, %43 : vector<2x8x8xf32>
    %45 = math.exp %44 : vector<2x8x8xf32>
    %cst_18 = arith.constant dense<0.000000e+00> : vector<2x8xf32>
    %46 = vector.multi_reduction <add>, %45, %cst_18 [2] : vector<2x8x8xf32> to vector<2x8xf32>
    %47 = vector.shape_cast %46 : vector<2x8xf32> to vector<2x8x1xf32>
    %48 = tpu.reciprocal %47 {approx = true} : vector<2x8x1xf32> -> vector<2x8x1xf32>
    %49 = vector.broadcast %48 : vector<2x8x1xf32> to vector<2x8x8xf32>
    %50 = arith.mulf %45, %49 : vector<2x8x8xf32>
    "tpu.trace_start"() <{level = 10 : i32, message = "bqk,bkd->bqd"}> : () -> ()
    %cst_19 = arith.constant dense<0.000000e+00> : vector<2x8x8xf32>
    %51 = tpu.matmul %50, %39, %cst_19 {dimension_numbers = #tpu.dot_dimension_numbers<[2], [1], [1], [2], [0, 0, 0, 1, 1, 2], [0], [0]>} : vector<2x8x8xf32>, vector<2x8x8xf32>, vector<2x8x8xf32> -> vector<2x8x8xf32>
    "tpu.trace_stop"() : () -> ()
    %52 = vector.shape_cast %51 : vector<2x8x8xf32> to vector<16x8xf32>
    %c8 = arith.constant 8 : index
    %c0_20 = arith.constant 0 : index
    %53 = vector.load %arg5[%c8, %c0_20] : memref<32x32xf32, #tpu.memory_space<vmem>>, vector<8x32xf32>
    %cst_21 = arith.constant dense<0.000000e+00> : vector<16x32xf32>
    %54 = tpu.matmul %52, %53, %cst_21 {dimension_numbers = #tpu.dot_dimension_numbers<[1], [0], [0], [1], [0, 0, 1, 1], [], []>} : vector<16x8xf32>, vector<8x32xf32>, vector<16x32xf32> -> vector<16x32xf32>
    %55 = arith.addf %36, %54 : vector<16x32xf32>
    %56 = vector.extract_strided_slice %12 {offsets = [0, 0, 16], sizes = [2, 8, 8], strides = [1, 1, 1]} : vector<2x8x32xf32> to vector<2x8x8xf32>
    %57 = vector.extract_strided_slice %14 {offsets = [0, 0, 16], sizes = [2, 8, 8], strides = [1, 1, 1]} : vector<2x8x32xf32> to vector<2x8x8xf32>
    %58 = vector.extract_strided_slice %16 {offsets = [0, 0, 16], sizes = [2, 8, 8], strides = [1, 1, 1]} : vector<2x8x32xf32> to vector<2x8x8xf32>
    "tpu.trace_start"() <{level = 10 : i32, message = "bqd,bkd->bqk"}> : () -> ()
    %cst_22 = arith.constant dense<0.000000e+00> : vector<2x8x8xf32>
    %59 = tpu.matmul %56, %57, %cst_22 {dimension_numbers = #tpu.dot_dimension_numbers<[2], [2], [1], [1], [0, 0, 0, 1, 1, 1], [0], [0]>} : vector<2x8x8xf32>, vector<2x8x8xf32>, vector<2x8x8xf32> -> vector<2x8x8xf32>
    "tpu.trace_stop"() : () -> ()
    %cst_23 = arith.constant dense<0xFF800000> : vector<2x8xf32>
    %60 = vector.multi_reduction <maximumf>, %59, %cst_23 [2] : vector<2x8x8xf32> to vector<2x8xf32>
    %61 = vector.shape_cast %60 : vector<2x8xf32> to vector<2x8x1xf32>
    %62 = vector.broadcast %61 : vector<2x8x1xf32> to vector<2x8x8xf32>
    %63 = arith.subf %59, %62 : vector<2x8x8xf32>
    %64 = math.exp %63 : vector<2x8x8xf32>
    %cst_24 = arith.constant dense<0.000000e+00> : vector<2x8xf32>
    %65 = vector.multi_reduction <add>, %64, %cst_24 [2] : vector<2x8x8xf32> to vector<2x8xf32>
    %66 = vector.shape_cast %65 : vector<2x8xf32> to vector<2x8x1xf32>
    %67 = tpu.reciprocal %66 {approx = true} : vector<2x8x1xf32> -> vector<2x8x1xf32>
    %68 = vector.broadcast %67 : vector<2x8x1xf32> to vector<2x8x8xf32>
    %69 = arith.mulf %64, %68 : vector<2x8x8xf32>
    "tpu.trace_start"() <{level = 10 : i32, message = "bqk,bkd->bqd"}> : () -> ()
    %cst_25 = arith.constant dense<0.000000e+00> : vector<2x8x8xf32>
    %70 = tpu.matmul %69, %58, %cst_25 {dimension_numbers = #tpu.dot_dimension_numbers<[2], [1], [1], [2], [0, 0, 0, 1, 1, 2], [0], [0]>} : vector<2x8x8xf32>, vector<2x8x8xf32>, vector<2x8x8xf32> -> vector<2x8x8xf32>
    "tpu.trace_stop"() : () -> ()
    %71 = vector.shape_cast %70 : vector<2x8x8xf32> to vector<16x8xf32>
    %c16 = arith.constant 16 : index
    %c0_26 = arith.constant 0 : index
    %72 = vector.load %arg5[%c16, %c0_26] : memref<32x32xf32, #tpu.memory_space<vmem>>, vector<8x32xf32>
    %cst_27 = arith.constant dense<0.000000e+00> : vector<16x32xf32>
    %73 = tpu.matmul %71, %72, %cst_27 {dimension_numbers = #tpu.dot_dimension_numbers<[1], [0], [0], [1], [0, 0, 1, 1], [], []>} : vector<16x8xf32>, vector<8x32xf32>, vector<16x32xf32> -> vector<16x32xf32>
    %74 = arith.addf %55, %73 : vector<16x32xf32>
    %75 = vector.extract_strided_slice %12 {offsets = [0, 0, 24], sizes = [2, 8, 8], strides = [1, 1, 1]} : vector<2x8x32xf32> to vector<2x8x8xf32>
    %76 = vector.extract_strided_slice %14 {offsets = [0, 0, 24], sizes = [2, 8, 8], strides = [1, 1, 1]} : vector<2x8x32xf32> to vector<2x8x8xf32>
    %77 = vector.extract_strided_slice %16 {offsets = [0, 0, 24], sizes = [2, 8, 8], strides = [1, 1, 1]} : vector<2x8x32xf32> to vector<2x8x8xf32>
    "tpu.trace_start"() <{level = 10 : i32, message = "bqd,bkd->bqk"}> : () -> ()
    %cst_28 = arith.constant dense<0.000000e+00> : vector<2x8x8xf32>
    %78 = tpu.matmul %75, %76, %cst_28 {dimension_numbers = #tpu.dot_dimension_numbers<[2], [2], [1], [1], [0, 0, 0, 1, 1, 1], [0], [0]>} : vector<2x8x8xf32>, vector<2x8x8xf32>, vector<2x8x8xf32> -> vector<2x8x8xf32>
    "tpu.trace_stop"() : () -> ()
    %cst_29 = arith.constant dense<0xFF800000> : vector<2x8xf32>
    %79 = vector.multi_reduction <maximumf>, %78, %cst_29 [2] : vector<2x8x8xf32> to vector<2x8xf32>
    %80 = vector.shape_cast %79 : vector<2x8xf32> to vector<2x8x1xf32>
    %81 = vector.broadcast %80 : vector<2x8x1xf32> to vector<2x8x8xf32>
    %82 = arith.subf %78, %81 : vector<2x8x8xf32>
    %83 = math.exp %82 : vector<2x8x8xf32>
    %cst_30 = arith.constant dense<0.000000e+00> : vector<2x8xf32>
    %84 = vector.multi_reduction <add>, %83, %cst_30 [2] : vector<2x8x8xf32> to vector<2x8xf32>
    %85 = vector.shape_cast %84 : vector<2x8xf32> to vector<2x8x1xf32>
    %86 = tpu.reciprocal %85 {approx = true} : vector<2x8x1xf32> -> vector<2x8x1xf32>
    %87 = vector.broadcast %86 : vector<2x8x1xf32> to vector<2x8x8xf32>
    %88 = arith.mulf %83, %87 : vector<2x8x8xf32>
    "tpu.trace_start"() <{level = 10 : i32, message = "bqk,bkd->bqd"}> : () -> ()
    %cst_31 = arith.constant dense<0.000000e+00> : vector<2x8x8xf32>
    %89 = tpu.matmul %88, %77, %cst_31 {dimension_numbers = #tpu.dot_dimension_numbers<[2], [1], [1], [2], [0, 0, 0, 1, 1, 2], [0], [0]>} : vector<2x8x8xf32>, vector<2x8x8xf32>, vector<2x8x8xf32> -> vector<2x8x8xf32>
    "tpu.trace_stop"() : () -> ()
    %90 = vector.shape_cast %89 : vector<2x8x8xf32> to vector<16x8xf32>
    %c24 = arith.constant 24 : index
    %c0_32 = arith.constant 0 : index
    %91 = vector.load %arg5[%c24, %c0_32] : memref<32x32xf32, #tpu.memory_space<vmem>>, vector<8x32xf32>
    %cst_33 = arith.constant dense<0.000000e+00> : vector<16x32xf32>
    %92 = tpu.matmul %90, %91, %cst_33 {dimension_numbers = #tpu.dot_dimension_numbers<[1], [0], [0], [1], [0, 0, 1, 1], [], []>} : vector<16x8xf32>, vector<8x32xf32>, vector<16x32xf32> -> vector<16x32xf32>
    %93 = arith.addf %74, %92 : vector<16x32xf32>
    %c0_34 = arith.constant 0 : index
    %c0_35 = arith.constant 0 : index
    %94 = vector.load %arg6[%c0_34, %c0_35] : memref<1x32xf32, #tpu.memory_space<vmem>>, vector<1x32xf32>
    %95 = vector.broadcast %94 : vector<1x32xf32> to vector<16x32xf32>
    %96 = arith.addf %93, %95 : vector<16x32xf32>
    %97 = arith.addf %5, %96 : vector<16x32xf32>
    %c0_36 = arith.constant 0 : index
    %c0_37 = arith.constant 0 : index
    %98 = vector.load %arg7[%c0_36, %c0_37] : memref<1x32xf32, #tpu.memory_space<vmem>>, vector<1x32xf32>
    %c0_38 = arith.constant 0 : index
    %c0_39 = arith.constant 0 : index
    %99 = vector.load %arg8[%c0_38, %c0_39] : memref<1x32xf32, #tpu.memory_space<vmem>>, vector<1x32xf32>
    %cst_40 = arith.constant dense<0.000000e+00> : vector<16xf32>
    %100 = vector.multi_reduction <add>, %97, %cst_40 [1] : vector<16x32xf32> to vector<16xf32>
    %101 = vector.shape_cast %100 : vector<16xf32> to vector<16x1xf32>
    %cst_41 = arith.constant 3.200000e+01 : f32
    %102 = vector.broadcast %cst_41 : f32 to vector<16x1xf32>
    %103 = arith.divf %101, %102 : vector<16x1xf32>
    %104 = vector.broadcast %103 : vector<16x1xf32> to vector<16x32xf32>
    %105 = arith.subf %97, %104 : vector<16x32xf32>
    %106 = arith.mulf %105, %105 : vector<16x32xf32>
    %cst_42 = arith.constant dense<0.000000e+00> : vector<16xf32>
    %107 = vector.multi_reduction <add>, %106, %cst_42 [1] : vector<16x32xf32> to vector<16xf32>
    %108 = vector.shape_cast %107 : vector<16xf32> to vector<16x1xf32>
    %cst_43 = arith.constant 3.200000e+01 : f32
    %109 = vector.broadcast %cst_43 : f32 to vector<16x1xf32>
    %110 = arith.divf %108, %109 : vector<16x1xf32>
    %111 = vector.broadcast %103 : vector<16x1xf32> to vector<16x32xf32>
    %112 = arith.subf %97, %111 : vector<16x32xf32>
    %cst_44 = arith.constant 9.99999974E-6 : f32
    %113 = vector.broadcast %cst_44 : f32 to vector<16x1xf32>
    %114 = arith.addf %110, %113 : vector<16x1xf32>
    %115 = math.rsqrt %114 : vector<16x1xf32>
    %116 = vector.broadcast %115 : vector<16x1xf32> to vector<16x32xf32>
    %117 = arith.mulf %112, %116 : vector<16x32xf32>
    %118 = vector.broadcast %98 : vector<1x32xf32> to vector<16x32xf32>
    %119 = arith.mulf %117, %118 : vector<16x32xf32>
    %120 = vector.broadcast %99 : vector<1x32xf32> to vector<16x32xf32>
    %121 = arith.addf %119, %120 : vector<16x32xf32>
    %c0_45 = arith.constant 0 : index
    %c0_46 = arith.constant 0 : index
    %122 = vector.load %arg9[%c0_45, %c0_46] : memref<32x64xf32, #tpu.memory_space<vmem>>, vector<32x64xf32>
    %cst_47 = arith.constant dense<0.000000e+00> : vector<16x64xf32>
    %123 = tpu.matmul %121, %122, %cst_47 {dimension_numbers = #tpu.dot_dimension_numbers<[1], [0], [0], [1], [0, 0, 1, 1], [], []>} : vector<16x32xf32>, vector<32x64xf32>, vector<16x64xf32> -> vector<16x64xf32>
    %c0_48 = arith.constant 0 : index
    %c0_49 = arith.constant 0 : index
    %124 = vector.load %arg10[%c0_48, %c0_49] : memref<1x64xf32, #tpu.memory_space<vmem>>, vector<1x64xf32>
    %125 = vector.broadcast %124 : vector<1x64xf32> to vector<16x64xf32>
    %126 = arith.addf %123, %125 : vector<16x64xf32>
    %cst_50 = arith.constant 5.000000e-01 : f32
    %127 = vector.broadcast %cst_50 : f32 to vector<16x64xf32>
    %128 = arith.mulf %127, %126 : vector<16x64xf32>
    %cst_51 = arith.constant 0.707106769 : f32
    %129 = vector.broadcast %cst_51 : f32 to vector<16x64xf32>
    %130 = arith.mulf %126, %129 : vector<16x64xf32>
    %131 = math.erf %130 : vector<16x64xf32>
    %cst_52 = arith.constant 1.000000e+00 : f32
    %132 = vector.broadcast %cst_52 : f32 to vector<16x64xf32>
    %133 = arith.addf %132, %131 : vector<16x64xf32>
    %134 = arith.mulf %128, %133 : vector<16x64xf32>
    %c0_53 = arith.constant 0 : index
    %c0_54 = arith.constant 0 : index
    %135 = vector.load %arg11[%c0_53, %c0_54] : memref<64x32xf32, #tpu.memory_space<vmem>>, vector<64x32xf32>
    %cst_55 = arith.constant dense<0.000000e+00> : vector<16x32xf32>
    %136 = tpu.matmul %134, %135, %cst_55 {dimension_numbers = #tpu.dot_dimension_numbers<[1], [0], [0], [1], [0, 0, 1, 1], [], []>} : vector<16x64xf32>, vector<64x32xf32>, vector<16x32xf32> -> vector<16x32xf32>
    %c0_56 = arith.constant 0 : index
    %c0_57 = arith.constant 0 : index
    %137 = vector.load %arg12[%c0_56, %c0_57] : memref<1x32xf32, #tpu.memory_space<vmem>>, vector<1x32xf32>
    %138 = vector.broadcast %137 : vector<1x32xf32> to vector<16x32xf32>
    %139 = arith.addf %136, %138 : vector<16x32xf32>
    %140 = arith.addf %121, %139 : vector<16x32xf32>
    %c0_58 = arith.constant 0 : index
    %c0_59 = arith.constant 0 : index
    %141 = vector.load %arg13[%c0_58, %c0_59] : memref<1x32xf32, #tpu.memory_space<vmem>>, vector<1x32xf32>
    %c0_60 = arith.constant 0 : index
    %c0_61 = arith.constant 0 : index
    %142 = vector.load %arg14[%c0_60, %c0_61] : memref<1x32xf32, #tpu.memory_space<vmem>>, vector<1x32xf32>
    %cst_62 = arith.constant dense<0.000000e+00> : vector<16xf32>
    %143 = vector.multi_reduction <add>, %140, %cst_62 [1] : vector<16x32xf32> to vector<16xf32>
    %144 = vector.shape_cast %143 : vector<16xf32> to vector<16x1xf32>
    %cst_63 = arith.constant 3.200000e+01 : f32
    %145 = vector.broadcast %cst_63 : f32 to vector<16x1xf32>
    %146 = arith.divf %144, %145 : vector<16x1xf32>
    %147 = vector.broadcast %146 : vector<16x1xf32> to vector<16x32xf32>
    %148 = arith.subf %140, %147 : vector<16x32xf32>
    %149 = arith.mulf %148, %148 : vector<16x32xf32>
    %cst_64 = arith.constant dense<0.000000e+00> : vector<16xf32>
    %150 = vector.multi_reduction <add>, %149, %cst_64 [1] : vector<16x32xf32> to vector<16xf32>
    %151 = vector.shape_cast %150 : vector<16xf32> to vector<16x1xf32>
    %cst_65 = arith.constant 3.200000e+01 : f32
    %152 = vector.broadcast %cst_65 : f32 to vector<16x1xf32>
    %153 = arith.divf %151, %152 : vector<16x1xf32>
    %154 = vector.broadcast %146 : vector<16x1xf32> to vector<16x32xf32>
    %155 = arith.subf %140, %154 : vector<16x32xf32>
    %cst_66 = arith.constant 9.99999974E-6 : f32
    %156 = vector.broadcast %cst_66 : f32 to vector<16x1xf32>
    %157 = arith.addf %153, %156 : vector<16x1xf32>
    %158 = math.rsqrt %157 : vector<16x1xf32>
    %159 = vector.broadcast %158 : vector<16x1xf32> to vector<16x32xf32>
    %160 = arith.mulf %155, %159 : vector<16x32xf32>
    %161 = vector.broadcast %141 : vector<1x32xf32> to vector<16x32xf32>
    %162 = arith.mulf %160, %161 : vector<16x32xf32>
    %163 = vector.broadcast %142 : vector<1x32xf32> to vector<16x32xf32>
    %164 = arith.addf %162, %163 : vector<16x32xf32>
    %165 = vector.shape_cast %164 : vector<16x32xf32> to vector<2x8x32xf32>
    %cst_67 = arith.constant dense<0.000000e+00> : vector<2x32xf32>
    %166 = vector.multi_reduction <add>, %165, %cst_67 [1] : vector<2x8x32xf32> to vector<2x32xf32>
    %cst_68 = arith.constant 8.000000e+00 : f32
    %167 = vector.broadcast %cst_68 : f32 to vector<2x32xf32>
    %168 = arith.divf %166, %167 : vector<2x32xf32>
    %c0_69 = arith.constant 0 : index
    %c0_70 = arith.constant 0 : index
    %169 = vector.load %arg15[%c0_69, %c0_70] : memref<32x128xf32, #tpu.memory_space<vmem>>, vector<32x128xf32>
    %cst_71 = arith.constant dense<0.000000e+00> : vector<2x128xf32>
    %170 = tpu.matmul %168, %169, %cst_71 {dimension_numbers = #tpu.dot_dimension_numbers<[1], [0], [0], [1], [0, 0, 1, 1], [], []>} : vector<2x32xf32>, vector<32x128xf32>, vector<2x128xf32> -> vector<2x128xf32>
    %c0_72 = arith.constant 0 : index
    %c0_73 = arith.constant 0 : index
    %171 = vector.load %arg16[%c0_72, %c0_73] : memref<1x128xf32, #tpu.memory_space<vmem>>, vector<1x128xf32>
    %172 = vector.broadcast %171 : vector<1x128xf32> to vector<2x128xf32>
    %173 = arith.addf %170, %172 : vector<2x128xf32>
    %c0_74 = arith.constant 0 : index
    %c0_75 = arith.constant 0 : index
    %174 = vector.load %arg17[%c0_74, %c0_75] : memref<2x128xf32, #tpu.memory_space<vmem>>, vector<2x128xf32>
    tpu.vector_store %arg17[%c0_74, %c0_75], %173 {strides = array<i32>} : memref<2x128xf32, #tpu.memory_space<vmem>>, vector<2x128xf32>,
    return
  }
  func.func @transform_0(%arg0: i32) -> (i32, i32, i32) {
    %c0_i32 = arith.constant 0 : i32
    %c0_i32_0 = arith.constant 0 : i32
    %c0_i32_1 = arith.constant 0 : i32
    return %arg0, %c0_i32, %c0_i32_0 : i32, i32, i32
  }
  func.func @transform_1(%arg0: i32) -> (i32, i32) {
    %c0_i32 = arith.constant 0 : i32
    %c0_i32_0 = arith.constant 0 : i32
    %c0_i32_1 = arith.constant 0 : i32
    return %c0_i32, %c0_i32_0 : i32, i32
  }
  func.func @transform_2(%arg0: i32) -> (i32, i32) {
    %c0_i32 = arith.constant 0 : i32
    %c0_i32_0 = arith.constant 0 : i32
    %c0_i32_1 = arith.constant 0 : i32
    return %c0_i32, %c0_i32_0 : i32, i32
  }
  func.func @transform_3(%arg0: i32) -> (i32, i32) {
    %c0_i32 = arith.constant 0 : i32
    %c0_i32_0 = arith.constant 0 : i32
    %c0_i32_1 = arith.constant 0 : i32
    return %c0_i32, %c0_i32_0 : i32, i32
  }
  func.func @transform_4(%arg0: i32) -> (i32, i32) {
    %c0_i32 = arith.constant 0 : i32
    %c0_i32_0 = arith.constant 0 : i32
    %c0_i32_1 = arith.constant 0 : i32
    return %c0_i32, %c0_i32_0 : i32, i32
  }
  func.func @transform_5(%arg0: i32) -> (i32, i32) {
    %c0_i32 = arith.constant 0 : i32
    %c0_i32_0 = arith.constant 0 : i32
    %c0_i32_1 = arith.constant 0 : i32
    return %c0_i32, %c0_i32_0 : i32, i32
  }
  func.func @transform_6(%arg0: i32) -> (i32, i32) {
    %c0_i32 = arith.constant 0 : i32
    %c0_i32_0 = arith.constant 0 : i32
    %c0_i32_1 = arith.constant 0 : i32
    return %c0_i32, %c0_i32_0 : i32, i32
  }
  func.func @transform_7(%arg0: i32) -> (i32, i32) {
    %c0_i32 = arith.constant 0 : i32
    %c0_i32_0 = arith.constant 0 : i32
    %c0_i32_1 = arith.constant 0 : i32
    return %c0_i32, %c0_i32_0 : i32, i32
  }
  func.func @transform_8(%arg0: i32) -> (i32, i32) {
    %c0_i32 = arith.constant 0 : i32
    %c0_i32_0 = arith.constant 0 : i32
    %c0_i32_1 = arith.constant 0 : i32
    return %c0_i32, %c0_i32_0 : i32, i32
  }
  func.func @transform_9(%arg0: i32) -> (i32, i32) {
    %c0_i32 = arith.constant 0 : i32
    %c0_i32_0 = arith.constant 0 : i32
    %c0_i32_1 = arith.constant 0 : i32
    return %c0_i32, %c0_i32_0 : i32, i32
  }
  func.func @transform_10(%arg0: i32) -> (i32, i32) {
    %c0_i32 = arith.constant 0 : i32
    %c0_i32_0 = arith.constant 0 : i32
    %c0_i32_1 = arith.constant 0 : i32
    return %c0_i32, %c0_i32_0 : i32, i32
  }
  func.func @transform_11(%arg0: i32) -> (i32, i32) {
    %c0_i32 = arith.constant 0 : i32
    %c0_i32_0 = arith.constant 0 : i32
    %c0_i32_1 = arith.constant 0 : i32
    return %c0_i32, %c0_i32_0 : i32, i32
  }
  func.func @transform_12(%arg0: i32) -> (i32, i32) {
    %c0_i32 = arith.constant 0 : i32
    %c0_i32_0 = arith.constant 0 : i32
    %c0_i32_1 = arith.constant 0 : i32
    return %c0_i32, %c0_i32_0 : i32, i32
  }
  func.func @transform_13(%arg0: i32) -> (i32, i32) {
    %c0_i32 = arith.constant 0 : i32
    %c0_i32_0 = arith.constant 0 : i32
    %c0_i32_1 = arith.constant 0 : i32
    return %c0_i32, %c0_i32_0 : i32, i32
  }
  func.func @transform_14(%arg0: i32) -> (i32, i32) {
    %c0_i32 = arith.constant 0 : i32
    %c0_i32_0 = arith.constant 0 : i32
    %c0_i32_1 = arith.constant 0 : i32
    return %c0_i32, %c0_i32_0 : i32, i32
  }
  func.func @transform_15(%arg0: i32) -> (i32, i32) {
    %c0_i32 = arith.constant 0 : i32
    %c0_i32_0 = arith.constant 0 : i32
    %c0_i32_1 = arith.constant 0 : i32
    return %c0_i32, %c0_i32_0 : i32, i32
  }
  func.func @transform_16(%arg0: i32) -> (i32, i32) {
    %c0_i32 = arith.constant 0 : i32
    %c0_i32_0 = arith.constant 0 : i32
    return %arg0, %c0_i32 : i32, i32
  }
}

</mosaic_0001>

<bundles_post_ra>
// kernel: tpu_custom_call.1
= control target key start
LH: loop header
LB: loop body
LE: loop exit
PB: predicated region body
PF: predicated region fallthrough
CT: control target
= control target key end

     0   :  { %s1728_s0 = inlined_call_operand.hbm [shape: f32[2,8,32], index: 0, kind: input, shape index: {}]   ;;  %s1729_s1 = inlined_call_operand.hbm [shape: f32[8,32], index: 1, kind: input, shape index: {}]   ;;  %s1730_s2 = inlined_call_operand.vmem [shape: f32[32,96], index: 2, kind: input, shape index: {}]   ;;  %s1731_s3 = inlined_call_operand.vmem [shape: f32[1,96], index: 3, kind: input, shape index: {}]   ;;  %s1732_s4 = inlined_call_operand.vmem [shape: f32[32,32], index: 4, kind: input, shape index: {}]   ;;  %s1733_s5 = inlined_call_operand.vmem [shape: f32[1,32], index: 5, kind: input, shape index: {}]   ;;  %s1734_s6 = inlined_call_operand.vmem [shape: f32[1,32], index: 6, kind: input, shape index: {}]   ;;  %s1735_s7 = inlined_call_operand.vmem [shape: f32[1,32], index: 7, kind: input, shape index: {}]   ;;  %s1736_s8 = inlined_call_operand.vmem [shape: f32[32,64], index: 8, kind: input, shape index: {}]   ;;  %s1737_s9 = inlined_call_operand.vmem [shape: f32[1,64], index: 9, kind: input, shape index: {}]   ;;  %s1738_s10 = inlined_call_operand.vmem [shape: f32[64,32], index: 10, kind: input, shape index: {}]   ;;  %s1739_s11 = inlined_call_operand.vmem [shape: f32[1,32], index: 11, kind: input, shape index: {}]   ;;  %s1740_s12 = inlined_call_operand.vmem [shape: f32[1,32], index: 12, kind: input, shape index: {}]   ;;  %s1741_s13 = inlined_call_operand.vmem [shape: f32[1,32], index: 13, kind: input, shape index: {}]   ;;  %s1742_s14 = inlined_call_operand.hbm [shape: f32[32,128], index: 14, kind: input, shape index: {}]   ;;  %s1743_s15 = inlined_call_operand.vmem [shape: f32[1,128], index: 15, kind: input, shape index: {}]   ;;  %s1744_s16 = inlined_call_operand.hbm [shape: f32[2,128], index: 16, kind: output, shape index: {}]  }
   0x1   :  { %1745 = sst [smem:[#allocation12_spill]] %s1728_s0 }
   0x2   :  { %21 = vsyncpa [#allocation3], 0 }
   0x3   :  { %22 = vsyncpa [#allocation6], 0  ;;  %s42_s23 = sshll.u32 %s1729_s1, 4  ;;  %s43_s23 = int_to_ptr.hbm [resolvable:$true] %s42_s23 }
   0x4   :  { %23 = vsyncpa [#allocation4], 0  ;;  %s1376_s24 = smov [#allocation5]   ;;  %s1746_s28 = sld [smem:[#allocation12_spill]] }
   0x5   :  { %s44_s25 = sshll.u32 %s1376_s24, 4  ;;  %s1377_s30 = smov [#allocation2]   ;;  %s45_s25 = int_to_ptr.vmem [resolvable:$true] %s44_s25 }
   0x6   :  { %47 = dma.hbm_to_vmem [thread:$0]  %s43_s23, 128, %s45_s25, [#allocation6]  }
   0x7   :  { %s30_s0 = sshll.u32 %s1377_s30, 4  ;;  %s1378_s17 = smov 128   ;;  %s31_s0 = int_to_ptr.vmem [resolvable:$true] %s30_s0 }
   0x8   :  { %s1379_s18 = smov 8   ;;  %s76_s1 = sshll.u32 %s1742_s14, 4  ;;  %s77_s1 = int_to_ptr.hbm [resolvable:$true] %s76_s1 }
   0x9   :  { %s1380_s21 = smov [#allocation7]  }
   0xa   :  { %s28_s29 = sshll.u32 %s1746_s28, 4  ;;  %s78_s22 = sshll.u32 %s1380_s21, 4  ;;  %s29_s29 = int_to_ptr.hbm [resolvable:$true] %s28_s29  ;;  %s79_s22 = int_to_ptr.vmem [resolvable:$true] %s78_s22 }
   0xb   :  { %36 = dma.hbm_to_vmem [thread:$0]  %s29_s29, 256, %s31_s0, [#allocation3], %s1378_s17, %s1378_s17, %s1379_s18  }
   0xc   :  { %84 = dma.hbm_to_vmem [thread:$0]  %s77_s1, 512, %s79_s22, [#allocation6], %s1378_s17, %s1378_s17, %s1379_s18  }
   0xd   :  { %1370 = dma.done.wait [#allocation3], 256  }
   0xe   :  { %1371 = vsyncadd [#allocation3], 4294967040 }
   0xf   :  { %1372 = dma.done.wait [#allocation6], 640  }
  0x10   :  { %1373 = vsyncadd [#allocation6], 4294966656  ;;  %v107_v0 = vld [vmem:[%s1730_s2 + $0x18] sm:$0xff]  ;;  %v106_v1 = vld [vmem:[%s1730_s2 + $0x10] sm:$0xff]  ;;  %vm112_vm0 = vcmask 261120   ;;  %s1382_s17 = smov 96  }
  0x11   :  { %131 = vmatpush.msra.mxu0 %v107_v0  ;;  %v99_v2 = vld [vmem:[#allocation2] sm:$0xff]  ;;  %v101_v3 = vld [vmem:[#allocation5] sm:$0xff]  ;;  %v105_v4 = vld [vmem:[%s1730_s2 + $0x8] sm:$0xff]  ;;  %s1383_s18 = smov 120   ;;  %vm145_vm1 = vcmask 64512   ;;  %s1385_s19 = smov 80  }
  0x12   :  { %v104_v5 = vld [vmem:[%s1730_s2] sm:$0xff]  ;;  %v1501_v6 = vadd.f32 %v101_v3, %v99_v2  ;;  %v100_v7 = vld [vmem:[#allocation2 + $0x8] sm:$0xff]  ;;  %s1381_s2 = smov 88   ;;  %s1386_s20 = smov 56   ;;  %vm993_vm15 = vcmask 523264  }
  0x13   :  { %132 = vmatpush.msra.mxu0 %v106_v1  ;;  %v1505_v8 = vadd.f32 %v101_v3, %v100_v7  ;;  %v1217_v9 = vld [vmem:[%s1731_s3] ss:$0 sm:$0xff]  ;;  %s1384_s3 = smov 64   ;;  %s1387_s1 = smov 112   ;;  %v402_v58 = vld [vmem:[%s1732_s4 + $0x8] sm:$0xff] }
  0x14   :  { %s1388_s21 = smov 48   ;;  %s1389_s22 = smov 72   ;;  %v271_v57 = vld [vmem:[%s1732_s4] sm:$0xff] }
  0x15   :  { %133 = vmatpush.msra.mxu0 %v105_v4  ;;  %s1390_s23 = smov 104   ;;  %s1391_s29 = smov 40  }
  0x17   :  { %134 = vmatpush.msra.mxu0 %v104_v5 }
  0x18   :  { %1157 = vmatmul.msk.f32.vlgmr.msra.gmra.mxu0 %vm112_vm0, %v1501_v6 }
  0x19   :  { %453 = vmatpush.msrb.mxu0 %v271_v57 }
  0x20   :  { %1158 = vmatmul.msk.f32.gmra.mxu0 %vm112_vm0, %v1505_v8 }
  0x95   :  { %v136_v10 = vpop.f32.mrf.mxu0 }
  0x96   :  { %v1512_v11 = vadd.f32 %v1217_v9, %v136_v10 }
  0x98   :  { %274 = vrot.lane.b32.xlu1 %v1512_v11, %s1381_s2  ;;  %143 = vrot.lane.b32.xlu0 %v1512_v11, %s1382_s17 }
  0x9d   :  { %v139_v12 = vpop.f32.mrf.mxu0 }
  0x9e   :  { %v1516_v13 = vadd.f32 %v1217_v9, %v139_v12 }
  0xa0   :  { %272 = vrot.lane.b32.xlu1 %v1512_v11, %s1383_s18  ;;  %171 = vrot.lane.b32.xlu0 %v1516_v13, %s1382_s17 }
  0xa8   :  { %302 = vrot.lane.b32.xlu1 %v1516_v13, %s1381_s2 }
 0x10a   :  { %v275_v14 = vpop.permute.xlu1 %274  ;;  %v144_v15 = vpop.permute.xlu0 %143 }
 0x10b   :  { %1159 = vmatpush.xpose.msk.msra.mxu1 %vm145_vm1, %v144_v15 }
 0x10e   :  { %1160 = vmatmul.msk.f32.vlgmr.msra.gmra.mxu1 %vm145_vm1, %v1512_v11 }
 0x10f   :  { %1165 = vmatpush.xpose.msk.msrb.mxu1 %vm145_vm1, %v275_v14 }
 0x112   :  { %v273_v16 = vpop.permute.xlu1 %272  ;;  %v172_v17 = vpop.permute.xlu0 %171 }
 0x113   :  { %1161 = vmatpush.xpose.msk.msra.mxu2 %vm145_vm1, %v172_v17 }
 0x116   :  { %1162 = vmatmul.msk.f32.vlgmr.msra.gmra.mxu2 %vm145_vm1, %v1516_v13  ;;  %1166 = vmatmul.msk.f32.vlgmr.msrb.gmra.mxu1 %vm145_vm1, %v273_v16 }
 0x11a   :  { %v303_v18 = vpop.permute.xlu1 %302 }
 0x11b   :  { %1167 = vmatpush.xpose.msk.msrb.mxu2 %vm145_vm1, %v303_v18 }
 0x11f   :  { %424 = vmatpush.msra.mxu2 %v402_v58 }
 0x18b   :  { %v167_v19 = vpop.f32.mrf.mxu1 }
 0x18c   :  { %v197_v20 = vsel %vm145_vm1, %v167_v19, -inf }
 0x18d   :  { %198 = vmax.xlane.f32.xlu2 %v197_v20 }
 0x193   :  { %v297_v21 = vpop.f32.mrf.mxu1 }
 0x194   :  { %v328_v22 = vsel %vm145_vm1, %v297_v21, -inf }
 0x195   :  { %329 = vmax.xlane.f32.xlu0 %v328_v22 }
 0x199   :  { %v194_v23 = vpop.f32.mrf.mxu2 }
 0x19a   :  { %v200_v24 = vsel %vm145_vm1, %v194_v23, -inf }
 0x19b   :  { %201 = vmax.xlane.f32.xlu2 %v200_v24 }
 0x1a9   :  { %245 = vrot.lane.b32.xlu0 %v1516_v13, %s1384_s3 }
 0x1b1   :  { %300 = vrot.lane.b32.xlu0 %v1516_v13, %s1383_s18 }
 0x1b3   :  { %219 = vrot.lane.b32.xlu2 %v1512_v11, %s1384_s3 }
 0x1b9   :  { %463 = vrot.lane.b32.xlu0 %v1512_v11, %s1385_s19 }
 0x1c1   :  { %491 = vrot.lane.b32.xlu0 %v1516_v13, %s1385_s19 }
 0x200   :  { %v199_v25 = vpop.xlane.xlu2 %198 }
 0x201   :  { %v203_v26 = vsub.f32 %v167_v19, %v199_v25 }
 0x203   :  { %v205_v27 = vmul.f32 1.442695, %v203_v26 }
 0x205   :  { %1226 = vpow2.f32 %v205_v27 }
 0x208   :  { %v330_v28 = vpop.xlane.xlu0 %329 }
 0x209   :  { %v334_v29 = vsub.f32 %v297_v21, %v330_v28 }
 0x20b   :  { %v1227_v30 = vpop.eup %1226  ;;  %v336_v31 = vmul.f32 1.442695, %v334_v29 }
 0x20c   :  { %v209_v32 = vsel %vm145_vm1, %v1227_v30, 0.0 }
 0x20d   :  { %1228 = vpow2.f32 %v336_v31  ;;  %210 = vadd.xlane.f32.xlu1 %v209_v32  ;;  %v591_v31 = vld [vmem:[%s1732_s4 + $0x10] sm:$0xff] }
 0x20e   :  { %v202_v33 = vpop.xlane.xlu2 %201 }
 0x20f   :  { %v204_v34 = vsub.f32 %v194_v23, %v202_v33 }
 0x211   :  { %v207_v35 = vmul.f32 1.442695, %v204_v34 }
 0x213   :  { %v1229_v36 = vpop.eup %1228  ;;  %1230 = vpow2.f32 %v207_v35 }
 0x214   :  { %v340_v37 = vsel %vm145_vm1, %v1229_v36, 0.0 }
 0x215   :  { %341 = vadd.xlane.f32.xlu2 %v340_v37 }
 0x216   :  { %v220_v38 = vpop.permute.xlu2 %219 }
 0x217   :  { %240 = vmatpush.msra.mxu3 %v220_v38 }
 0x219   :  { %v1231_v39 = vpop.eup %1230 }
 0x21a   :  { %v212_v41 = vsel %vm145_vm1, %v1231_v39, 0.0 }
 0x21b   :  { %v246_v40 = vpop.permute.xlu0 %245 }
 0x21c   :  { %266 = vmatpush.msrb.mxu3 %v246_v40 }
 0x21d   :  { %213 = vadd.xlane.f32.xlu2 %v212_v41 }
 0x223   :  { %v301_v42 = vpop.permute.xlu0 %300 }
 0x224   :  { %1168 = vmatmul.msk.f32.vlgmr.msrb.gmra.mxu2 %vm145_vm1, %v301_v42 }
 0x225   :  { %613 = vmatpush.msrb.mxu2 %v591_v31 }
 0x226   :  { %350 = vrot.lane.b32.xlu1 %v1512_v11, %s1386_s20 }
 0x22b   :  { %v464_v51 = vpop.permute.xlu0 %463 }
 0x233   :  { %v492_v7 = vpop.permute.xlu0 %491 }
 0x235   :  { %461 = vrot.lane.b32.xlu2 %v1512_v11, %s1387_s1 }
 0x280   :  { %v211_v43 = vpop.xlane.xlu1 %210 }
 0x281   :  { %1232 = vrcp.f32 %v211_v43 }
 0x287   :  { %v1233_v44 = vpop.eup %1232 }
 0x288   :  { %v342_v45 = vpop.xlane.xlu2 %341  ;;  %v217_v46 = vmul.f32 %v1233_v44, %v1227_v30 }
 0x28a   :  { %1163 = vmatmul.msk.f32.vlgmr.msra.gmra.mxu3 %vm145_vm1, %v217_v46 }
 0x290   :  { %v214_v47 = vpop.xlane.xlu2 %213 }
 0x291   :  { %1234 = vrcp.f32 %v214_v47 }
 0x292   :  { %1236 = vrcp.f32 %v342_v45 }
 0x297   :  { %v1235_v48 = vpop.eup %1234 }
 0x298   :  { %v351_v49 = vpop.permute.xlu1 %350  ;;  %v218_v50 = vmul.f32 %v1235_v48, %v1231_v39  ;;  %v1237_v52 = vpop.eup %1236 }
 0x299   :  { %371 = vmatpush.msra.mxu3 %v351_v49  ;;  %v348_v53 = vmul.f32 %v1237_v52, %v1229_v36  ;;  %v462_v56 = vpop.permute.xlu2 %461 }
 0x29a   :  { %1164 = vmatmul.msk.f32.vlgmr.msrb.gmra.mxu3 %vm145_vm1, %v218_v50 }
 0x29b   :  { %1175 = vmatpush.xpose.msk.msrb.mxu3 %vm145_vm1, %v464_v51 }
 0x2a2   :  { %1169 = vmatmul.msk.f32.vlgmr.msra.gmra.mxu3 %vm145_vm1, %v348_v53 }
 0x2a7   :  { %v325_v54 = vpop.f32.mrf.mxu2 }
 0x2a8   :  { %v331_v55 = vsel %vm145_vm1, %v325_v54, -inf }
 0x2a9   :  { %332 = vmax.xlane.f32.xlu1 %v331_v55 }
 0x2aa   :  { %1176 = vmatmul.msk.f32.vlgmr.msrb.gmra.mxu3 %vm145_vm1, %v462_v56 }
 0x2c2   :  { %376 = vrot.lane.b32.xlu1 %v1516_v13, %s1386_s20 }
 0x2ca   :  { %539 = vrot.lane.b32.xlu1 %v1512_v11, %s1388_s21 }
 0x2d2   :  { %653 = vrot.lane.b32.xlu1 %v1516_v13, %s1389_s22 }
 0x2da   :  { %651 = vrot.lane.b32.xlu1 %v1516_v13, %s1390_s23 }
 0x30d   :  { %v242_v59 = vpop.f32.mrf.mxu3 }
 0x30e   :  { %1173 = vmatmul.msk.f32.vlgmr.msrb.gmra.mxu0 %vm145_vm1, %v242_v59 }
 0x31c   :  { %v333_v60 = vpop.xlane.xlu1 %332 }
 0x31d   :  { %v335_v61 = vsub.f32 %v325_v54, %v333_v60  ;;  %v268_v62 = vpop.f32.mrf.mxu3 }
 0x31e   :  { %1174 = vmatmul.msk.f32.gmra.mxu0 %vm145_vm1, %v268_v62 }
 0x31f   :  { %v338_v63 = vmul.f32 1.442695, %v335_v61 }
 0x321   :  { %1238 = vpow2.f32 %v338_v63 }
 0x325   :  { %v373_v0 = vpop.f32.mrf.mxu3 }
 0x326   :  { %1171 = vmatmul.msk.f32.vlgmr.msra.gmra.mxu2 %vm145_vm1, %v373_v0 }
 0x327   :  { %v1239_v1 = vpop.eup %1238 }
 0x328   :  { %v343_v2 = vsel %vm145_vm1, %v1239_v1, 0.0 }
 0x329   :  { %344 = vadd.xlane.f32.xlu2 %v343_v2 }
 0x32d   :  { %v486_v3 = vpop.f32.mrf.mxu3 }
 0x32e   :  { %v517_v4 = vsel %vm145_vm1, %v486_v3, -inf }
 0x32f   :  { %518 = vmax.xlane.f32.xlu0 %v517_v4 }
 0x334   :  { %v377_v5 = vpop.permute.xlu1 %376 }
 0x335   :  { %397 = vmatpush.msra.mxu1 %v377_v5 }
 0x337   :  { %1177 = vmatpush.xpose.msk.msrb.mxu1 %vm145_vm1, %v492_v7 }
 0x33c   :  { %v540_v9 = vpop.permute.xlu1 %539 }
 0x33d   :  { %560 = vmatpush.msra.mxu3 %v540_v9 }
 0x341   :  { %489 = vrot.lane.b32.xlu2 %v1516_v13, %s1387_s1 }
 0x343   :  { %625 = vrot.lane.b32.xlu0 %v1512_v11, %s1389_s22  ;;  %s1394_s22 = smov [#allocation8]  }
 0x344   :  { %v654_v10 = vpop.permute.xlu1 %653 }
 0x345   :  { %1185 = vmatpush.xpose.msk.msrb.mxu3 %vm145_vm1, %v654_v10 }
 0x34c   :  { %v652_v29 = vpop.permute.xlu1 %651 }
 0x38b   :  { %v1589_v34 = vpop.f32.mrf.mxu0 }
 0x39b   :  { %v1591_v37 = vpop.f32.mrf.mxu0 }
 0x39c   :  { %v345_v12 = vpop.xlane.xlu2 %344 }
 0x39d   :  { %1240 = vrcp.f32 %v345_v12  ;;  %v1218_v12 = vld [vmem:[%s1733_s5] ss:$0 sm:$0xff] }
 0x3a2   :  { %v519_v14 = vpop.xlane.xlu0 %518 }
 0x3a3   :  { %v1241_v15 = vpop.eup %1240  ;;  %v523_v16 = vsub.f32 %v486_v3, %v519_v14 }
 0x3a4   :  { %v349_v17 = vmul.f32 %v1241_v15, %v1239_v1  ;;  %v490_v20 = vpop.permute.xlu2 %489 }
 0x3a5   :  { %v525_v18 = vmul.f32 1.442695, %v523_v16 }
 0x3a6   :  { %1170 = vmatmul.msk.f32.vlgmr.msra.gmra.mxu1 %vm145_vm1, %v349_v17 }
 0x3a7   :  { %1242 = vpow2.f32 %v525_v18 }
 0x3a9   :  { %v426_v4 = vpop.f32.mrf.mxu2 }
 0x3aa   :  { %v456_v9 = vadd.f32 %v1589_v34, %v426_v4 }
 0x3ad   :  { %v1243_v19 = vpop.eup %1242 }
 0x3ae   :  { %1178 = vmatmul.msk.f32.vlgmr.msrb.gmra.mxu1 %vm145_vm1, %v490_v20  ;;  %v529_v21 = vsel %vm145_vm1, %v1243_v19, 0.0 }
 0x3af   :  { %530 = vadd.xlane.f32.xlu0 %v529_v21 }
 0x3b5   :  { %v626_v22 = vpop.permute.xlu0 %625 }
 0x3b6   :  { %1183 = vmatpush.xpose.msk.msra.mxu0 %vm145_vm1, %v626_v22 }
 0x3c3   :  { %623 = vrot.lane.b32.xlu0 %v1512_v11, %s1390_s23  ;;  %s1144_s23 = sshll.u32 %s1394_s22, 4  ;;  %s1145_s23 = int_to_ptr.vmem [resolvable:$true] %s1144_s23 }
 0x422   :  { %v531_v23 = vpop.xlane.xlu0 %530 }
 0x423   :  { %1244 = vrcp.f32 %v531_v23  ;;  %v399_v24 = vpop.f32.mrf.mxu1 }
 0x424   :  { %1172 = vmatmul.msk.f32.gmra.mxu2 %vm145_vm1, %v399_v24 }
 0x429   :  { %v1245_v25 = vpop.eup %1244 }
 0x42a   :  { %v537_v26 = vmul.f32 %v1245_v25, %v1243_v19 }
 0x42b   :  { %v514_v27 = vpop.f32.mrf.mxu1 }
 0x42c   :  { %1179 = vmatmul.msk.f32.vlgmr.msra.gmra.mxu3 %vm145_vm1, %v537_v26  ;;  %v520_v28 = vsel %vm145_vm1, %v514_v27, -inf }
 0x42d   :  { %521 = vmax.xlane.f32.xlu2 %v520_v28 }
 0x434   :  { %1186 = vmatmul.msk.f32.vlgmr.msrb.gmra.mxu3 %vm145_vm1, %v652_v29 }
 0x435   :  { %v624_v30 = vpop.permute.xlu0 %623 }
 0x436   :  { %1184 = vmatmul.msk.f32.vlgmr.msra.gmra.mxu0 %vm145_vm1, %v624_v30 }
 0x4a0   :  { %v522_v32 = vpop.xlane.xlu2 %521 }
 0x4a1   :  { %v524_v33 = vsub.f32 %v514_v27, %v522_v32  ;;  %v1392_v27 = vmov 32.0  }
 0x4a3   :  { %v527_v35 = vmul.f32 1.442695, %v524_v33 }
 0x4a5   :  { %1246 = vpow2.f32 %v527_v35 }
 0x4a7   :  { %v429_v5 = vpop.f32.mrf.mxu2 }
 0x4a8   :  { %v459_v18 = vadd.f32 %v1591_v37, %v429_v5 }
 0x4ab   :  { %v1247_v36 = vpop.eup %1246 }
 0x4ac   :  { %v532_v38 = vsel %vm145_vm1, %v1247_v36, 0.0 }
 0x4ad   :  { %533 = vadd.xlane.f32.xlu2 %v532_v38 }
 0x4af   :  { %v562_v39 = vpop.f32.mrf.mxu3 }
 0x4b0   :  { %1181 = vmatmul.msk.f32.vlgmr.msrb.gmra.mxu2 %vm145_vm1, %v562_v39 }
 0x4b3   :  { %v648_v40 = vpop.f32.mrf.mxu0 }
 0x4b4   :  { %v679_v41 = vsel %vm145_vm1, %v648_v40, -inf }
 0x4b5   :  { %680 = vmax.xlane.f32.xlu0 %v679_v41 }
 0x4b7   :  { %v676_v42 = vpop.f32.mrf.mxu3 }
 0x4b8   :  { %v682_v43 = vsel %vm145_vm1, %v676_v42, -inf }
 0x4b9   :  { %683 = vmax.xlane.f32.xlu1 %v682_v43  ;;  %v858_v43 = vld [vmem:[%s1736_s8 + $0x10] sm:$0xff] }
 0x4d2   :  { %565 = vrot.lane.b32.xlu1 %v1516_v13, %s1388_s21 }
 0x520   :  { %v534_v53 = vpop.xlane.xlu2 %533 }
 0x528   :  { %v681_v44 = vpop.xlane.xlu0 %680 }
 0x529   :  { %v685_v45 = vsub.f32 %v648_v40, %v681_v44  ;;  %v857_v44 = vld [vmem:[%s1736_s8 + $0x8] sm:$0xff] }
 0x52b   :  { %v687_v46 = vmul.f32 1.442695, %v685_v45  ;;  %v856_v45 = vld [vmem:[%s1736_s8] sm:$0xff] }
 0x52c   :  { %v684_v47 = vpop.xlane.xlu1 %683 }
 0x52d   :  { %1248 = vpow2.f32 %v687_v46  ;;  %v686_v48 = vsub.f32 %v676_v42, %v684_v47  ;;  %v859_v42 = vld [vmem:[%s1736_s8 + $0x18] sm:$0xff] }
 0x52f   :  { %v689_v49 = vmul.f32 1.442695, %v686_v48 }
 0x531   :  { %1250 = vpow2.f32 %v689_v49 }
 0x532   :  { %1252 = vrcp.f32 %v534_v53 }
 0x533   :  { %v1249_v50 = vpop.eup %1248  ;;  %v615_v7 = vpop.f32.mrf.mxu2 }
 0x534   :  { %v691_v51 = vsel %vm145_vm1, %v1249_v50, 0.0  ;;  %v621_v10 = vadd.f32 %v615_v7, %v456_v9 }
 0x535   :  { %692 = vadd.xlane.f32.xlu0 %v691_v51 }
 0x537   :  { %v1251_v52 = vpop.eup %1250 }
 0x538   :  { %v694_v54 = vsel %vm145_vm1, %v1251_v52, 0.0  ;;  %v1253_v55 = vpop.eup %1252 }
 0x539   :  { %695 = vadd.xlane.f32.xlu2 %v694_v54  ;;  %v538_v56 = vmul.f32 %v1253_v55, %v1247_v36 }
 0x544   :  { %v566_v57 = vpop.permute.xlu1 %565 }
 0x545   :  { %586 = vmatpush.msra.mxu1 %v566_v57 }
 0x546   :  { %1180 = vmatmul.msk.f32.vlgmr.msra.gmra.mxu1 %vm145_vm1, %v538_v56 }
 0x549   :  { %701 = vrot.lane.b32.xlu0 %v1512_v11, %s1391_s29  ;;  %v753_v11 = vld [vmem:[%s1732_s4 + $0x18] sm:$0xff] }
 0x54a   :  { %775 = vmatpush.msra.mxu3 %v753_v11 }
 0x551   :  { %727 = vrot.lane.b32.xlu2 %v1516_v13, %s1391_s29 }
 0x5a8   :  { %v693_v59 = vpop.xlane.xlu0 %692 }
 0x5ac   :  { %v696_v58 = vpop.xlane.xlu2 %695 }
 0x5ad   :  { %1254 = vrcp.f32 %v696_v58 }
 0x5ae   :  { %1256 = vrcp.f32 %v693_v59 }
 0x5af   :  { %1258 = vrcp.f32 %v1392_v27  ;;  %v986_v27 = vld [vmem:[%s1738_s10 + $0x28] sm:$0xff] }
 0x5b3   :  { %v1255_v60 = vpop.eup %1254 }
 0x5b4   :  { %v700_v61 = vmul.f32 %v1255_v60, %v1251_v52  ;;  %v728_v62 = vpop.permute.xlu2 %727  ;;  %v1257_v63 = vpop.eup %1256  ;;  %v1219_v60 = vld [vmem:[%s1734_s6] ss:$0 sm:$0xff] }
 0x5b5   :  { %748 = vmatpush.msrb.mxu0 %v728_v62  ;;  %v699_v0 = vmul.f32 %v1257_v63, %v1249_v50  ;;  %v1259_v28 = vpop.eup %1258 }
 0x5b6   :  { %1188 = vmatmul.msk.f32.vlgmr.msrb.gmra.mxu0 %vm145_vm1, %v700_v61  ;;  %v802_v29 = vmul.f32 32.0, %v1259_v28  ;;  %vm806_vm2 = vweird.f32 %v1259_v28 }
 0x5b8   :  { %v803_v30 = vsub.f32 1.0, %v802_v29 }
 0x5ba   :  { %v804_v31 = vmul.f32 %v1259_v28, %v803_v30 }
 0x5bb   :  { %v702_v1 = vpop.permute.xlu0 %701 }
 0x5bc   :  { %722 = vmatpush.msrb.mxu1 %v702_v1  ;;  %v805_v32 = vadd.f32 %v1259_v28, %v804_v31  ;;  %v985_v31 = vld [vmem:[%s1738_s10 + $0x20] sm:$0xff] }
 0x5bd   :  { %1187 = vmatmul.msk.f32.vlgmr.msrb.gmra.mxu1 %vm145_vm1, %v699_v0  ;;  %v1220_v0 = vld [vmem:[%s1735_s7] ss:$0 sm:$0xff]  ;;  %s1146_s7 = sshll.u32 %s1744_s16, 4  ;;  %s1147_s7 = int_to_ptr.hbm [resolvable:$true] %s1146_s7 }
 0x5be   :  { %882 = vmatpush.msra.mxu1 %v859_v42 }
 0x5c0   :  { %883 = vmatpush.msra.mxu1 %v858_v43  ;;  %v982_v43 = vld [vmem:[%s1738_s10 + $0x8] sm:$0xff] }
 0x5c2   :  { %884 = vmatpush.msra.mxu1 %v857_v44 }
 0x5c3   :  { %v588_v2 = vpop.f32.mrf.mxu1 }
 0x5c4   :  { %1182 = vmatmul.msk.f32.gmra.mxu2 %vm145_vm1, %v588_v2  ;;  %885 = vmatpush.msra.mxu1 %v856_v45 }
 0x633   :  { %v750_v3 = vpop.f32.mrf.mxu0 }
 0x63a   :  { %v724_v13 = vpop.f32.mrf.mxu1 }
 0x63b   :  { %1189 = vmatmul.msk.f32.vlgmr.msra.gmra.mxu3 %vm145_vm1, %v724_v13 }
 0x643   :  { %1190 = vmatmul.msk.f32.gmra.mxu3 %vm145_vm1, %v750_v3 }
 0x647   :  { %v618_v17 = vpop.f32.mrf.mxu2 }
 0x648   :  { %v622_v20 = vadd.f32 %v618_v17, %v459_v18 }
 0x6be   :  { %v777_v14 = vpop.f32.mrf.mxu3 }
 0x6bf   :  { %v783_v15 = vadd.f32 %v777_v14, %v621_v10  ;;  %v1221_v10 = vld [vmem:[%s1737_s9] ss:$0 sm:$0xff] }
 0x6c1   :  { %v789_v16 = vadd.f32 %v1218_v12, %v783_v15 }
 0x6c3   :  { %v791_v19 = vadd.f32 %v789_v16, %v1501_v6  ;;  %v1621_v6 = vsel %vm806_vm2, %v1259_v28, %v805_v32 }
 0x6c5   :  { %v795_v21 = vsel %vm112_vm0, %v791_v19, 0.0 }
 0x6c6   :  { %796 = vadd.xlane.f32.xlu1 %v795_v21  ;;  %v780_v22 = vpop.f32.mrf.mxu3 }
 0x6c7   :  { %v784_v23 = vadd.f32 %v780_v22, %v622_v20 }
 0x6c9   :  { %v790_v24 = vadd.f32 %v1218_v12, %v784_v23  ;;  %v987_v23 = vld [vmem:[%s1738_s10 + $0x30] sm:$0xff] }
 0x6cb   :  { %v792_v25 = vadd.f32 %v790_v24, %v1505_v8 }
 0x6cd   :  { %v798_v26 = vsel %vm112_vm0, %v792_v25, 0.0 }
 0x6ce   :  { %799 = vadd.xlane.f32.xlu0 %v798_v26 }
 0x739   :  { %v797_v33 = vpop.xlane.xlu1 %796 }
 0x73a   :  { %v808_v34 = vmul.f32 %v1621_v6, %v797_v33 }
 0x73c   :  { %v810_v35 = vsub.f32 %v791_v19, %v808_v34  ;;  %v988_v19 = vld [vmem:[%s1738_s10 + $0x38] sm:$0xff] }
 0x73d   :  { %1008 = vmatpush.msra.mxu2 %v988_v19 }
 0x73e   :  { %v812_v36 = vmul.f32 %v810_v35, %v810_v35 }
 0x73f   :  { %1009 = vmatpush.msra.mxu2 %v987_v23 }
 0x740   :  { %v814_v8 = vsel %vm112_vm0, %v812_v36, 0.0 }
 0x741   :  { %815 = vadd.xlane.f32.xlu2 %v814_v8  ;;  %v800_v37 = vpop.xlane.xlu0 %799  ;;  %1010 = vmatpush.msra.mxu2 %v986_v27 }
 0x742   :  { %v809_v38 = vmul.f32 %v1621_v6, %v800_v37 }
 0x743   :  { %1011 = vmatpush.msra.mxu2 %v985_v31 }
 0x744   :  { %v811_v39 = vsub.f32 %v792_v25, %v809_v38  ;;  %v983_v38 = vld [vmem:[%s1738_s10 + $0x10] sm:$0xff] }
 0x746   :  { %v813_v40 = vmul.f32 %v811_v39, %v811_v39 }
 0x748   :  { %v817_v41 = vsel %vm112_vm0, %v813_v40, 0.0 }
 0x749   :  { %818 = vadd.xlane.f32.xlu1 %v817_v41 }
 0x7b4   :  { %v816_v46 = vpop.xlane.xlu2 %815 }
 0x7b5   :  { %v820_v47 = vmul.f32 %v816_v46, %v1621_v6 }
 0x7b7   :  { %v822_v48 = vadd.f32 1e-05, %v820_v47  ;;  %v981_v47 = vld [vmem:[%s1738_s10] sm:$0xff] }
 0x7b9   :  { %1260 = vrsqrt.f32 %v822_v48  ;;  %vm830_vm4 = vweird.f32 %v822_v48 }
 0x7bc   :  { %v819_v49 = vpop.xlane.xlu1 %818 }
 0x7bd   :  { %v821_v50 = vmul.f32 %v819_v49, %v1621_v6 }
 0x7bf   :  { %v1261_v51 = vpop.eup %1260  ;;  %v823_v52 = vadd.f32 1e-05, %v821_v50 }
 0x7c0   :  { %v825_v53 = vmul.f32 %v1261_v51, %v822_v48  ;;  %vm831_vm3 = vweird.f32 %v1261_v51 }
 0x7c1   :  { %1262 = vrsqrt.f32 %v823_v52  ;;  %vm832_vm5 = vmor %vm830_vm4, %vm831_vm3  ;;  %vm840_vm7 = vweird.f32 %v823_v52 }
 0x7c2   :  { %v826_v54 = vmul.f32 %v1261_v51, %v825_v53 }
 0x7c4   :  { %v827_v55 = vmul.f32 0.5, %v826_v54 }
 0x7c6   :  { %v828_v56 = vsub.f32 1.5, %v827_v55 }
 0x7c7   :  { %v1263_v57 = vpop.eup %1262 }
 0x7c8   :  { %v829_v58 = vmul.f32 %v1261_v51, %v828_v56  ;;  %v835_v59 = vmul.f32 %v1263_v57, %v823_v52  ;;  %vm841_vm6 = vweird.f32 %v1263_v57 }
 0x7c9   :  { %vm842_vm8 = vmor %vm840_vm7, %vm841_vm6 }
 0x7ca   :  { %v833_v61 = vsel %vm832_vm5, %v1261_v51, %v829_v58  ;;  %v836_v62 = vmul.f32 %v1263_v57, %v835_v59 }
 0x7cb   :  { %v844_v63 = vmul.f32 %v833_v61, %v810_v35  ;;  %v984_v35 = vld [vmem:[%s1738_s10 + $0x18] sm:$0xff] }
 0x7cc   :  { %v837_v1 = vmul.f32 0.5, %v836_v62  ;;  %1012 = vmatpush.msra.mxu2 %v984_v35 }
 0x7cd   :  { %v849_v2 = vmul.f32 %v1219_v60, %v844_v63 }
 0x7ce   :  { %v838_v11 = vsub.f32 1.5, %v837_v1  ;;  %1013 = vmatpush.msra.mxu2 %v983_v38 }
 0x7cf   :  { %v1647_v13 = vadd.f32 %v1220_v0, %v849_v2 }
 0x7d0   :  { %v839_v3 = vmul.f32 %v1263_v57, %v838_v11  ;;  %1014 = vmatpush.msra.mxu2 %v982_v43 }
 0x7d1   :  { %1191 = vmatmul.msk.f32.vlgmr.msra.gmra.mxu1 %vm112_vm0, %v1647_v13 }
 0x7d2   :  { %v843_v4 = vsel %vm842_vm8, %v1263_v57, %v839_v3  ;;  %1015 = vmatpush.msra.mxu2 %v981_v47 }
 0x7d3   :  { %v845_v5 = vmul.f32 %v843_v4, %v811_v39 }
 0x7d5   :  { %v850_v7 = vmul.f32 %v1219_v60, %v845_v5 }
 0x7d7   :  { %v1651_v9 = vadd.f32 %v1220_v0, %v850_v7 }
 0x7d9   :  { %1192 = vmatmul.msk.f32.gmra.mxu1 %vm112_vm0, %v1651_v9 }
 0x84e   :  { %v887_v12 = vpop.f32.mrf.mxu1 }
 0x84f   :  { %v1658_v14 = vadd.f32 %v1221_v10, %v887_v12 }
 0x851   :  { %v1661_v15 = vmul.f32 0.70710677, %v1658_v14 }
 0x853   :  { %v897_v16 = vmul.f32 %v1661_v15, %v1661_v15 }
 0x855   :  { %v898_v17 = vmin.f32 %v897_v16, 16.0 }
 0x856   :  { %v890_v18 = vpop.f32.mrf.mxu1 }
 0x857   :  { %v899_v20 = vmul.f32 2.1237322e-06, %v898_v17  ;;  %v910_v21 = vmul.f32 3.8918573e-05, %v898_v17  ;;  %v1668_v22 = vadd.f32 %v1221_v10, %v890_v18 }
 0x859   :  { %v900_v24 = vadd.f32 0.00028619796, %v899_v20  ;;  %v911_v25 = vadd.f32 0.001143296, %v910_v21  ;;  %v1674_v26 = vmul.f32 0.70710677, %v1668_v22 }
 0x85b   :  { %v901_v28 = vmul.f32 %v900_v24, %v898_v17  ;;  %v912_v29 = vmul.f32 %v911_v25, %v898_v17  ;;  %v937_v30 = vmul.f32 %v1674_v26, %v1674_v26 }
 0x85d   :  { %v913_v32 = vadd.f32 0.014752088, %v912_v29  ;;  %v902_v33 = vadd.f32 0.0036580483, %v901_v28  ;;  %v938_v34 = vmin.f32 %v937_v30, 16.0 }
 0x85f   :  { %v914_v36 = vmul.f32 %v913_v32, %v898_v17  ;;  %v939_v8 = vmul.f32 2.1237322e-06, %v938_v34  ;;  %v950_v37 = vmul.f32 3.8918573e-05, %v938_v34  ;;  %v903_v40 = vmul.f32 %v902_v33, %v898_v17 }
 0x860   :  { %v893_v33 = vmul.f32 0.5, %v1658_v14  ;;  %v1222_v14 = vld [vmem:[%s1739_s11] ss:$0 sm:$0xff] }
 0x861   :  { %v915_v39 = vadd.f32 0.112945676, %v914_v36  ;;  %v940_v41 = vadd.f32 0.00028619796, %v939_v8  ;;  %v951_v42 = vadd.f32 0.001143296, %v950_v37 }
 0x862   :  { %v904_v49 = vadd.f32 0.05243302, %v903_v40 }
 0x863   :  { %v916_v44 = vmul.f32 %v915_v39, %v898_v17  ;;  %v941_v45 = vmul.f32 %v940_v41, %v938_v34  ;;  %v952_v46 = vmul.f32 %v951_v42, %v938_v34  ;;  %v894_v41 = vmul.f32 0.5, %v1668_v22 }
 0x864   :  { %v905_v55 = vmul.f32 %v904_v49, %v898_v17 }
 0x865   :  { %v917_v48 = vadd.f32 0.4994258, %v916_v44  ;;  %v953_v50 = vadd.f32 0.014752088, %v952_v46  ;;  %v942_v52 = vadd.f32 0.0036580483, %v941_v45 }
 0x866   :  { %v906_v59 = vadd.f32 0.18741608, %v905_v55 }
 0x867   :  { %v918_v51 = vmul.f32 %v917_v48, %v898_v17  ;;  %v954_v53 = vmul.f32 %v953_v50, %v938_v34  ;;  %v943_v57 = vmul.f32 %v942_v52, %v938_v34 }
 0x868   :  { %v907_v0 = vmul.f32 %v906_v59, %v898_v17 }
 0x869   :  { %v919_v54 = vadd.f32 1.0, %v918_v51  ;;  %v955_v56 = vadd.f32 0.112945676, %v954_v53  ;;  %v944_v61 = vadd.f32 0.05243302, %v943_v57 }
 0x86a   :  { %v908_v5 = vadd.f32 1.1283791, %v907_v0  ;;  %v1105_v0 = vld [vmem:[#allocation7 + $0x8] sm:$0xff] }
 0x86b   :  { %1264 = vrcp.f32 %v919_v54  ;;  %v956_v58 = vmul.f32 %v955_v56, %v938_v34  ;;  %v945_v11 = vmul.f32 %v944_v61, %v938_v34  ;;  %v931_v4 = vand.u32 2147483648, %v919_v54  ;;  %v1107_v61 = vld [vmem:[#allocation7 + $0x18] sm:$0xff] }
 0x86c   :  { %v929_v10 = vand.u32 2147483647, %v919_v54  ;;  %vm925_vm10 = vweird.f32 %v919_v54  ;;  %v909_v20 = vmul.f32 %v908_v5, %v1661_v15  ;;  %1130 = vmatpush.msra.mxu0 %v1107_v61 }
 0x86d   :  { %v957_v60 = vadd.f32 0.4994258, %v956_v58  ;;  %v946_v12 = vadd.f32 0.18741608, %v945_v11  ;;  %v932_v18 = vor.u32 1.1754944e-38, %v931_v4  ;;  %v1104_v11 = vld [vmem:[#allocation7] sm:$0xff] }
 0x86e   :  { %vm930_vm12 = vcmp.eq.f32.partialorder %v929_v10, 8.507059e+37 }
 0x86f   :  { %v958_v62 = vmul.f32 %v957_v60, %v938_v34  ;;  %v947_v23 = vmul.f32 %v946_v12, %v938_v34 }
 0x871   :  { %v1265_v63 = vpop.eup %1264  ;;  %v959_v2 = vadd.f32 1.0, %v958_v62  ;;  %v948_v30 = vadd.f32 1.1283791, %v947_v23  ;;  %v1106_v62 = vld [vmem:[#allocation7 + $0x10] sm:$0xff]  ;;  %v1393_v23 = vmov 8.0  }
 0x872   :  { %v921_v1 = vmul.f32 %v1265_v63, %v919_v54  ;;  %vm926_vm9 = vweird.f32 %v1265_v63  ;;  %1131 = vmatpush.msra.mxu0 %v1106_v62 }
 0x873   :  { %1266 = vrcp.f32 %v959_v2  ;;  %vm927_vm11 = vmor %vm925_vm10, %vm926_vm9  ;;  %v971_v29 = vand.u32 2147483648, %v959_v2  ;;  %v969_v32 = vand.u32 2147483647, %v959_v2  ;;  %vm965_vm14 = vweird.f32 %v959_v2 }
 0x874   :  { %v922_v3 = vsub.f32 1.0, %v921_v1  ;;  %v949_v34 = vmul.f32 %v948_v30, %v1674_v26  ;;  %1132 = vmatpush.msra.mxu0 %v1105_v0  ;;  %vm1114_vm10 = vcmask 1041409  }
 0x875   :  { %v972_v8 = vor.u32 1.1754944e-38, %v971_v29  ;;  %vm970_vm2 = vcmp.eq.f32.partialorder %v969_v32, 8.507059e+37 }
 0x876   :  { %v923_v7 = vmul.f32 %v1265_v63, %v922_v3  ;;  %1133 = vmatpush.msra.mxu0 %v1104_v11 }
 0x878   :  { %v924_v16 = vadd.f32 %v1265_v63, %v923_v7 }
 0x879   :  { %v1267_v19 = vpop.eup %1266 }
 0x87a   :  { %v928_v21 = vsel %vm927_vm11, %v1265_v63, %v924_v16  ;;  %v961_v24 = vmul.f32 %v1267_v19, %v959_v2  ;;  %vm966_vm13 = vweird.f32 %v1267_v19 }
 0x87b   :  { %v933_v17 = vsel %vm930_vm12, %v932_v18, %v928_v21  ;;  %vm967_vm1 = vmor %vm965_vm14, %vm966_vm13  ;;  %v1223_v18 = vld [vmem:[%s1740_s12] ss:$0 sm:$0xff] }
 0x87c   :  { %v934_v25 = vmul.f32 %v933_v17, %v909_v20  ;;  %v962_v27 = vsub.f32 1.0, %v961_v24  ;;  %v1224_v20 = vld [vmem:[%s1741_s13] ss:$0 sm:$0xff] }
 0x87e   :  { %v1193_v28 = vclamps-f32 %v934_v25, 1.0  ;;  %v963_v31 = vmul.f32 %v1267_v19, %v962_v27 }
 0x880   :  { %v977_v35 = vadd.f32 1.0, %v1193_v28  ;;  %v964_v36 = vadd.f32 %v1267_v19, %v963_v31 }
 0x882   :  { %v979_v15 = vmul.f32 %v977_v35, %v893_v33  ;;  %v968_v37 = vsel %vm967_vm1, %v1267_v19, %v964_v36 }
 0x883   :  { %v973_v38 = vsel %vm970_vm2, %v972_v8, %v968_v37 }
 0x884   :  { %1195 = vmatmul.msk.f32.vlgmr.msra.gmra.mxu2 %vm993_vm15, %v979_v15  ;;  %v974_v39 = vmul.f32 %v973_v38, %v949_v34 }
 0x886   :  { %v1194_v40 = vclamps-f32 %v974_v39, 1.0 }
 0x888   :  { %v978_v42 = vadd.f32 1.0, %v1194_v40 }
 0x88a   :  { %v980_v43 = vmul.f32 %v978_v42, %v894_v41 }
 0x88c   :  { %1196 = vmatmul.msk.f32.gmra.mxu2 %vm993_vm15, %v980_v43 }
 0x907   :  { %v1017_v44 = vpop.f32.mrf.mxu2 }
 0x908   :  { %v1018_v45 = vadd.f32 %v1222_v14, %v1017_v44 }
 0x90a   :  { %v1023_v46 = vadd.f32 %v1018_v45, %v1647_v13 }
 0x90c   :  { %v1027_v26 = vsel %vm112_vm0, %v1023_v46, 0.0 }
 0x90d   :  { %1028 = vadd.xlane.f32.xlu0 %v1027_v26 }
 0x90f   :  { %v1020_v47 = vpop.f32.mrf.mxu2 }
 0x910   :  { %v1021_v48 = vadd.f32 %v1222_v14, %v1020_v47 }
 0x912   :  { %v1024_v49 = vadd.f32 %v1021_v48, %v1651_v9 }
 0x914   :  { %v1030_v22 = vsel %vm112_vm0, %v1024_v49, 0.0 }
 0x915   :  { %1031 = vadd.xlane.f32.xlu1 %v1030_v22 }
 0x980   :  { %v1029_v50 = vpop.xlane.xlu0 %1028 }
 0x981   :  { %v1033_v51 = vmul.f32 %v1029_v50, %v1621_v6 }
 0x983   :  { %v1035_v52 = vsub.f32 %v1023_v46, %v1033_v51 }
 0x985   :  { %v1037_v53 = vmul.f32 %v1035_v52, %v1035_v52 }
 0x987   :  { %v1039_v54 = vsel %vm112_vm0, %v1037_v53, 0.0 }
 0x988   :  { %1040 = vadd.xlane.f32.xlu0 %v1039_v54  ;;  %v1032_v55 = vpop.xlane.xlu1 %1031 }
 0x989   :  { %v1034_v13 = vmul.f32 %v1032_v55, %v1621_v6 }
 0x98b   :  { %v1036_v56 = vsub.f32 %v1024_v49, %v1034_v13 }
 0x98d   :  { %v1038_v57 = vmul.f32 %v1036_v56, %v1036_v56 }
 0x98f   :  { %v1042_v58 = vsel %vm112_vm0, %v1038_v57, 0.0 }
 0x990   :  { %1043 = vadd.xlane.f32.xlu2 %v1042_v58 }
 0x9fb   :  { %v1041_v9 = vpop.xlane.xlu0 %1040 }
 0x9fc   :  { %v1045_v59 = vmul.f32 %v1041_v9, %v1621_v6 }
 0x9fe   :  { %v1047_v60 = vadd.f32 1e-05, %v1045_v59 }
 0xa00   :  { %1268 = vrsqrt.f32 %v1047_v60  ;;  %vm1055_vm4 = vweird.f32 %v1047_v60 }
 0xa03   :  { %v1044_v63 = vpop.xlane.xlu2 %1043 }
 0xa04   :  { %v1046_v1 = vmul.f32 %v1044_v63, %v1621_v6 }
 0xa06   :  { %v1269_v2 = vpop.eup %1268  ;;  %v1048_v4 = vadd.f32 1e-05, %v1046_v1 }
 0xa07   :  { %v1050_v3 = vmul.f32 %v1269_v2, %v1047_v60  ;;  %vm1056_vm3 = vweird.f32 %v1269_v2 }
 0xa08   :  { %1270 = vrsqrt.f32 %v1048_v4  ;;  %vm1057_vm5 = vmor %vm1055_vm4, %vm1056_vm3  ;;  %vm1065_vm7 = vweird.f32 %v1048_v4 }
 0xa09   :  { %v1051_v5 = vmul.f32 %v1269_v2, %v1050_v3  ;;  %1272 = vrcp.f32 %v1393_v23 }
 0xa0b   :  { %v1052_v7 = vmul.f32 0.5, %v1051_v5 }
 0xa0d   :  { %v1053_v10 = vsub.f32 1.5, %v1052_v7 }
 0xa0e   :  { %v1271_v12 = vpop.eup %1270 }
 0xa0f   :  { %v1054_v16 = vmul.f32 %v1269_v2, %v1053_v10  ;;  %v1060_v6 = vmul.f32 %v1271_v12, %v1048_v4  ;;  %vm1066_vm6 = vweird.f32 %v1271_v12  ;;  %v1273_v29 = vpop.eup %1272 }
 0xa10   :  { %vm1067_vm8 = vmor %vm1065_vm7, %vm1066_vm6  ;;  %v1096_v15 = vmul.f32 8.0, %v1273_v29  ;;  %vm1100_vm9 = vweird.f32 %v1273_v29 }
 0xa11   :  { %v1058_v19 = vsel %vm1057_vm5, %v1269_v2, %v1054_v16  ;;  %v1061_v17 = vmul.f32 %v1271_v12, %v1060_v6 }
 0xa12   :  { %v1069_v21 = vmul.f32 %v1058_v19, %v1035_v52  ;;  %v1097_v38 = vsub.f32 1.0, %v1096_v15  ;;  %v1225_v52 = vld [vmem:[%s1743_s15] ss:$0 sm:$0xff] }
 0xa13   :  { %v1062_v25 = vmul.f32 0.5, %v1061_v17 }
 0xa14   :  { %v1074_v24 = vmul.f32 %v1223_v18, %v1069_v21  ;;  %v1098_v42 = vmul.f32 %v1273_v29, %v1097_v38 }
 0xa15   :  { %v1063_v28 = vsub.f32 1.5, %v1062_v25 }
 0xa16   :  { %v1079_v27 = vadd.f32 %v1224_v20, %v1074_v24  ;;  %v1099_v45 = vadd.f32 %v1273_v29, %v1098_v42 }
 0xa17   :  { %v1064_v31 = vmul.f32 %v1271_v12, %v1063_v28 }
 0xa18   :  { %v1081_v30 = vsel %vm112_vm0, %v1079_v27, 0.0  ;;  %v1101_v48 = vsel %vm1100_vm9, %v1273_v29, %v1099_v45 }
 0xa19   :  { %v1082_v32 = vrot.slane %v1081_v30, 4  ;;  %v1068_v33 = vsel %vm1067_vm8, %v1271_v12, %v1064_v31 }
 0xa1a   :  { %v1070_v35 = vmul.f32 %v1068_v33, %v1036_v56 }
 0xa1b   :  { %v1083_v36 = vadd.f32 %v1082_v32, %v1081_v30 }
 0xa1c   :  { %v1075_v8 = vmul.f32 %v1223_v18, %v1070_v35 }
 0xa1d   :  { %v1084_v34 = vrot.slane %v1083_v36, 2 }
 0xa1e   :  { %v1080_v37 = vadd.f32 %v1224_v20, %v1075_v8 }
 0xa1f   :  { %v1085_v41 = vadd.f32 %v1084_v34, %v1083_v36 }
 0xa20   :  { %v1088_v39 = vsel %vm112_vm0, %v1080_v37, 0.0 }
 0xa21   :  { %v1089_v40 = vrot.slane %v1088_v39, 4  ;;  %v1086_v14 = vrot.slane %v1085_v41, 1 }
 0xa23   :  { %v1090_v43 = vadd.f32 %v1089_v40, %v1088_v39  ;;  %v1087_v26 = vadd.f32 %v1086_v14, %v1085_v41 }
 0xa25   :  { %v1091_v44 = vrot.slane %v1090_v43, 2  ;;  %v1102_v22 = vmul.f32 %v1101_v48, %v1087_v26 }
 0xa27   :  { %v1092_v46 = vadd.f32 %v1091_v44, %v1090_v43 }
 0xa29   :  { %v1093_v47 = vrot.slane %v1092_v46, 1 }
 0xa2b   :  { %v1094_v49 = vadd.f32 %v1093_v47, %v1092_v46 }
 0xa2d   :  { %v1103_v50 = vmul.f32 %v1101_v48, %v1094_v49 }
 0xa2f   :  { %v1115_v51 = vsel %vm1114_vm10, %v1103_v50, %v1102_v22 }
 0xa30   :  { %1197 = vmatmul.msk.f32.vlgmr.msra.gmra.mxu0 %vm112_vm0, %v1115_v51 }
 0xaad   :  { %v1135_v53 = vpop.f32.mrf.mxu0 }
 0xaae   :  { %v1136_v54 = vadd.f32 %v1225_v52, %v1135_v53 }
 0xab0   :  { %1138 = vst [vmem:[#allocation8] sm:$0x3] %v1136_v54 }
 0xab1   :  { %1149 = dma.vmem_to_hbm [thread:$0]  %s1145_s23, 32, %s1147_s7, [#allocation4]  }
 0xab2   :  { %1374 = dma.done.wait [#allocation4], 32  }
 0xab3   :  { %1375 = vsyncadd [#allocation4], 4294967264 }
 0xab4   :  { %1154 = vsyncpa [#allocation3], 1 }
 0xab5   :  { %1155 = vsyncpa [#allocation6], 1 }
 0xab6   :  { %1156 = vsyncpa [#allocation4], 1 }

</bundles_post_ra>
